<compile_context>
chip_gen: v6e
topology: v6e:2x2x1
jax: 0.10.0
libtpu: 0.0.40
codegen_flags: <defaults>
</compile_context>

<pallas_src>
import jax
import jax.numpy as jnp
import numpy as np
from jax import lax
from jax.experimental import pallas as pl
from jax.experimental.pallas import tpu as pltpu


def _generator_kernel(shots_ref, nodes_ref, cfold_ref, whh_ref, blstm_ref,
                      wuv_ref, buv_ref, out_ref):
    # shots_ref: (W, BB, N, N)     nodes_ref: (W, BB, N, Fin)
    # cfold_ref: (Fin, W, N, 4H)   whh_ref:   (H, 4H)   blstm_ref: (1, 4H)
    # wuv_ref:   (H, 2N)           buv_ref:   (1, 2N)   out_ref:   (BB, N, N)
    Wn, BB, N, _ = shots_ref.shape
    Fin = nodes_ref.shape[-1]
    H = whh_ref.shape[0]

    # ---------- GCN for ALL (window, batch-row) pairs at once (off the chain) ----------
    row = lax.broadcasted_iota(jnp.int32, (N, N), 0)
    col = lax.broadcasted_iota(jnp.int32, (N, N), 1)
    eye = jnp.where(row == col, 1.0, 0.0).astype(jnp.float32)

    s = shots_ref[...] + eye                                  # (W, BB, N, N)
    d = jnp.sum(s, axis=-1, keepdims=True)                    # row degree (W, BB, N, 1)
    dinv = lax.rsqrt(jnp.maximum(d, 1e-12))                   # clamp (d>=1 here anyway)
    ns = dinv * nodes_ref[...]                                # (W, BB, N, Fin)

    # pre = D^-1/2 (A+I) D^-1/2 X  -- one batched matmul over all W*BB tiles.
    s3 = s.reshape(Wn * BB, N, N)
    ns3 = ns.reshape(Wn * BB, N, Fin)
    pre = jnp.einsum('bij,bjf->bif', s3, ns3,
                     preferred_element_type=jnp.float32)
    pre = dinv * pre.reshape(Wn, BB, N, Fin)                  # (W, BB, N, Fin)

    # ---------- folded (Wg o W_ih) input projection for all windows ----------
    # gx_all[w, b, :] = sum_{n,k} pre[w, b, n, k] * cfold[k, w, n, :]
    gacc = pre[..., 0:1] * cfold_ref[0][:, None, :, :]        # (W, BB, N, 4H)
    for k in range(1, Fin):
        gacc = gacc + pre[..., k:k + 1] * cfold_ref[k][:, None, :, :]
    gx_all = jnp.sum(gacc, axis=2)                            # (W, BB, 4H)

    # ---------- LSTM recurrence: the only serial chain left ----------
    whh = whh_ref[...]                                        # hoisted loads
    b_lstm = blstm_ref[...]
    h = jnp.zeros((BB, H), jnp.float32)
    c = jnp.zeros((BB, H), jnp.float32)
    for w in range(Wn):
        gates = gx_all[w] + b_lstm + jnp.dot(
            h, whh, preferred_element_type=jnp.float32)       # (BB, 4H)
        sg = jax.nn.sigmoid(gates)                            # one full-vreg pass
        th = jnp.tanh(gates)                                  # one full-vreg pass
        i_g = sg[:, 0:H]
        f_g = sg[:, H:2 * H]
        g_g = th[:, 2 * H:3 * H]
        o_g = sg[:, 3 * H:4 * H]
        c = f_g * c + i_g * g_g
        h = o_g * jnp.tanh(c)

    # ---------- folded f1/f2 head:  a0[b,i,j] = u[b,i] + v[b,j] ----------
    uv = jnp.dot(h, wuv_ref[...], preferred_element_type=jnp.float32) + buv_ref[...]
    u = uv[:, :N]                                             # (BB, N)
    v = uv[:, N:]                                             # (BB, N)
    ub = jnp.broadcast_to(u[:, None, :], (BB, N, N))          # [b,i,j] = u[b,j]
    a0 = jnp.transpose(ub, (0, 2, 1)) + v[:, None, :]         # [b,i,j] = u[b,i]+v[b,j]

    # compare_and_update double loop -> exact closed form:
    #   diag -> 0; for i<j keep a[i,j] iff a[i,j] >= a[j,i] and a[i,j] > 0;
    #   for i>j keep a[i,j] iff a[i,j] >  a[j,i] and a[i,j] >= 0.
    a0t = jnp.transpose(a0, (0, 2, 1))
    ii = lax.broadcasted_iota(jnp.int32, (BB, N, N), 1)
    jj = lax.broadcasted_iota(jnp.int32, (BB, N, N), 2)
    keep = (((ii < jj) & (a0 >= a0t) & (a0 > 0.0))
            | ((ii > jj) & (a0 > a0t) & (a0 >= 0.0)))
    r = jnp.where(keep, a0, 0.0)

    # F.normalize(p=1, dim=2); divide on the EUP (approx reciprocal, uniform
    # per-row scale so it cannot flip the comparisons above).
    norm = jnp.maximum(jnp.sum(jnp.abs(r), axis=-1, keepdims=True), 1e-12)
    # NOTE: (BB, N, N) store has an 8-wide minor dim (masked vst); at this
    # output volume (<1 KiB) a lane-dense (BB, N*N) slab is not worth the
    # in-kernel relayout.
    out_ref[...] = r * pl.reciprocal(norm, approx=True)


def generator_forward(in_shots, in_node, a_unused, params):
    del a_unused  # the PyTorch forward immediately overwrites `a`
    B, W, N, _ = in_shots.shape
    Fin = in_node.shape[-1]
    Fout = params["wg"].shape[-1]
    H = params["whh"].shape[1]
    NF = N * Fout
    H4 = 4 * H

    # --- batch packing policy: BB rows per grid step, keep >= 2 grid steps so
    #     v7x's two TensorCores both get work; BB capped at 8 (f32 sublanes). ---
    BB = max(1, min(8, -(-B // 2)))
    G = -(-B // BB)
    B_pad = G * BB
    if B_pad != B:
        pad = B_pad - B
        in_shots = jnp.pad(in_shots, ((0, pad), (0, 0), (0, 0), (0, 0)))
        in_node = jnp.pad(in_node, ((0, pad), (0, 0), (0, 0), (0, 0)))

    # window-major layout so the kernel's LSTM loop slices a contiguous leading
    # axis (gx_all[w]) instead of a mid-axis extract on the serial chain.
    shots_t = jnp.transpose(in_shots, (1, 0, 2, 3))           # (W, B_pad, N, N)
    nodes_t = jnp.transpose(in_node, (1, 0, 2, 3))            # (W, B_pad, N, Fin)

    # --- fold the GCN feature weight into the LSTM input projection ---
    wih3 = params["wih"].T.reshape(N, Fout, H4)               # (N, Fout, 4H)
    # cfold[k, w, n, :] = sum_f Wg[w, k, f] * W_ih.T[n*Fout + f, :]
    cfold = jnp.einsum('wkf,nfh->kwnh', params["wg"], wih3)   # (Fin, W, N, 4H)

    whh_t = params["whh"].T                                   # (H, 4H)
    b_lstm = (params["bih"] + params["bhh"]).reshape(1, H4)

    # --- fold f1 and f2 into one (H, 2N) head ---
    w1_t = params["w1"].T                                     # (H, NF)
    b1 = params["b1"].reshape(1, NF)
    w2 = params["w2"]                                         # (1, 2*Fout)
    wu = jnp.kron(jnp.eye(N, dtype=jnp.float32), w2[0, :Fout].reshape(Fout, 1))
    wv = jnp.kron(jnp.eye(N, dtype=jnp.float32), w2[0, Fout:].reshape(Fout, 1))
    wuv_full = jnp.concatenate([wu, wv], axis=1)              # (NF, 2N)
    w_uv = w1_t @ wuv_full                                    # (H, 2N)
    b_uv = b1 @ wuv_full                                      # (1, 2N)
    b_uv = b_uv.at[:, :N].add(params["b2"][0])                # b2 folded into u bias

    out = pl.pallas_call(
        _generator_kernel,
        out_shape=jax.ShapeDtypeStruct((B_pad, N, N), jnp.float32),
        grid=(G,),
        in_specs=[
            pl.BlockSpec((W, BB, N, N), lambda g: (0, g, 0, 0)),
            pl.BlockSpec((W, BB, N, Fin), lambda g: (0, g, 0, 0)),
            # grid-invariant weights (fetched once; pl.Buffered(1) would only
            # save a ~128 KiB second buffer, irrelevant here):
            pl.BlockSpec((Fin, W, N, H4), lambda g: (0, 0, 0, 0)),
            pl.BlockSpec((H, H4), lambda g: (0, 0)),
            pl.BlockSpec((1, H4), lambda g: (0, 0)),
            pl.BlockSpec((H, 2 * N), lambda g: (0, 0)),
            pl.BlockSpec((1, 2 * N), lambda g: (0, 0)),
        ],
        out_specs=pl.BlockSpec((BB, N, N), lambda g: (g, 0, 0)),
        # batch blocks are fully independent -> v7x splits them across both TCs
        compiler_params=pltpu.CompilerParams(dimension_semantics=("parallel",)),
    )(shots_t, nodes_t, cfold, whh_t, b_lstm, w_uv, b_uv)
    return out[:B]


def init_params(key, W, N, Fin, Fout, H):
    ks = jax.random.split(key, 8)
    xav = (6.0 / (Fin + Fout)) ** 0.5          # xavier_uniform bound for gcn weights
    k_lstm = 1.0 / (H ** 0.5)
    k_f1 = 1.0 / (H ** 0.5)
    k_f2 = 1.0 / ((2 * Fout) ** 0.5)
    u = jax.random.uniform
    return {
        "wg": u(ks[0], (W, Fin, Fout), jnp.float32, -xav, xav),
        "wih": u(ks[1], (4 * H, N * Fout), jnp.float32, -k_lstm, k_lstm),
        "whh": u(ks[2], (4 * H, H), jnp.float32, -k_lstm, k_lstm),
        "bih": u(ks[3], (4 * H,), jnp.float32, -k_lstm, k_lstm),
        "bhh": u(ks[4], (4 * H,), jnp.float32, -k_lstm, k_lstm),
        "w1": u(ks[5], (N * Fout, H), jnp.float32, -k_f1, k_f1),
        "b1": u(ks[6], (N * Fout,), jnp.float32, -k_f1, k_f1),
        "w2": u(ks[7], (1, 2 * Fout), jnp.float32, -k_f2, k_f2),
        "b2": jnp.zeros((1,), jnp.float32),
    }


def reference_forward(in_shots, in_node, params):
    """Pure numpy reference mirroring the PyTorch code (incl. the sequential loops)."""
    in_shots = np.asarray(in_shots, np.float64)
    in_node = np.asarray(in_node, np.float64)
    p = {k: np.asarray(v, np.float64) for k, v in params.items()}
    B, W, N, _ = in_shots.shape
    Fout = p["wg"].shape[-1]
    H = p["whh"].shape[1]
    eye = np.eye(N)
    s = in_shots + eye
    D = (s.sum(-1, keepdims=True) ** -0.5) * eye
    adj = D @ s @ D
    gcn = adj @ in_node @ p["wg"][None]
    x = gcn.reshape(B, W, -1)
    h = np.zeros((B, H)); c = np.zeros((B, H))
    sig = lambda z: 1.0 / (1.0 + np.exp(-z))
    for t in range(W):
        g = x[:, t] @ p["wih"].T + p["bih"] + h @ p["whh"].T + p["bhh"]
        i_g, f_g = sig(g[:, :H]), sig(g[:, H:2 * H])
        g_g, o_g = np.tanh(g[:, 2 * H:3 * H]), sig(g[:, 3 * H:])
        c = f_g * c + i_g * g_g
        h = o_g * np.tanh(c)
    out = (h @ p["w1"].T + p["b1"]).reshape(B, N, Fout)
    a = np.ones((B, N, N))
    for i in range(N):
        for j in range(N):
            cat = np.concatenate([out[:, i, :], out[:, j, :]], axis=1)
            a[:, i, j] = cat @ p["w2"][0] + p["b2"][0]
    for i in range(N):
        for j in range(N):
            m = a[:, i, j] >= a[:, j, i]
            a[:, i, j] = np.where(m, a[:, i, j], 0.0)
            a[:, j, i] = np.where(m, 0.0, a[:, j, i])
    norm = np.maximum(np.abs(a).sum(axis=2, keepdims=True), 1e-12)
    return a / norm


if __name__ == "__main__":
    B, W, N, Fin, Fout, H = 2, 8, 8, 4, 4, 32
    key = jax.random.PRNGKey(0)
    k1, k2, k3 = jax.random.split(key, 3)
    in_shots = jax.random.uniform(k1, (B, W, N, N), jnp.float32)       # positive weights
    in_node = jax.random.normal(k2, (B, W, N, Fin), jnp.float32) * 0.5
    a_in = jnp.ones((B, N, N), jnp.float32)                            # overwritten by forward
    params = init_params(k3, W, N, Fin, Fout, H)

    fwd = jax.jit(generator_forward)
    out = fwd(in_shots, in_node, a_in, params)
    out = jax.block_until_ready(out)

    ref = reference_forward(in_shots, in_node, params)
    assert out.shape == (B, N, N)
    assert np.allclose(np.asarray(out), ref, atol=5e-3, rtol=5e-3)
    print("KERNEL_OK")
</pallas_src>

<mosaic_0001>
module attributes {stable_mosaic.version = 11 : i64} {
  func.func @_generator_kernel(%arg0: i32, %arg1: memref<8x1x8x8xf32, #tpu.memory_space<vmem>>, %arg2: memref<8x1x8x4xf32, #tpu.memory_space<vmem>>, %arg3: memref<4x8x8x128xf32, #tpu.memory_space<vmem>>, %arg4: memref<32x128xf32, #tpu.memory_space<vmem>>, %arg5: memref<1x128xf32, #tpu.memory_space<vmem>>, %arg6: memref<32x16xf32, #tpu.memory_space<vmem>>, %arg7: memref<1x16xf32, #tpu.memory_space<vmem>>, %arg8: memref<1x8x8xf32, #tpu.memory_space<vmem>>) attributes {dimension_semantics = [#tpu.dimension_semantics<parallel>], iteration_bounds = array<i64: 2>, scalar_prefetch = 0 : i64, scratch_operands = 0 : i64, tpu.core_type = #tpu.core_type<tc>, window_params = [{transform_indices = @transform_0, window_bounds = array<i64: 8, 1, 8, 8>}, {transform_indices = @transform_1, window_bounds = array<i64: 8, 1, 8, 4>}, {pipeline_mode = #tpu.pipeline_mode<synchronous>, transform_indices = @transform_2, window_bounds = array<i64: 4, 8, 8, 128>}, {pipeline_mode = #tpu.pipeline_mode<synchronous>, transform_indices = @transform_3, window_bounds = array<i64: 32, 128>}, {pipeline_mode = #tpu.pipeline_mode<synchronous>, transform_indices = @transform_4, window_bounds = array<i64: 1, 128>}, {pipeline_mode = #tpu.pipeline_mode<synchronous>, transform_indices = @transform_5, window_bounds = array<i64: 32, 16>}, {pipeline_mode = #tpu.pipeline_mode<synchronous>, transform_indices = @transform_6, window_bounds = array<i64: 1, 16>}, {transform_indices = @transform_7, window_bounds = array<i64: 1, 8, 8>}]} {
    %0 = tpu.iota {dimensions = array<i32: 0>} : vector<8x8xi32>
    %1 = tpu.iota {dimensions = array<i32: 1>} : vector<8x8xi32>
    %2 = arith.cmpi eq, %0, %1 : vector<8x8xi32>
    %cst = arith.constant 1.000000e+00 : f32
    %cst_0 = arith.constant 0.000000e+00 : f32
    %3 = vector.broadcast %cst : f32 to vector<8x8xf32>
    %4 = vector.broadcast %cst_0 : f32 to vector<8x8xf32>
    %5 = arith.select %2, %3, %4 : vector<8x8xi1>, vector<8x8xf32>
    %c0 = arith.constant 0 : index
    %c0_1 = arith.constant 0 : index
    %c0_2 = arith.constant 0 : index
    %c0_3 = arith.constant 0 : index
    %6 = vector.load %arg1[%c0, %c0_1, %c0_2, %c0_3] : memref<8x1x8x8xf32, #tpu.memory_space<vmem>>, vector<8x1x8x8xf32>
    %7 = vector.shape_cast %5 : vector<8x8xf32> to vector<1x1x8x8xf32>
    %8 = vector.broadcast %7 : vector<1x1x8x8xf32> to vector<8x1x8x8xf32>
    %9 = arith.addf %6, %8 : vector<8x1x8x8xf32>
    %cst_4 = arith.constant dense<0.000000e+00> : vector<8x1x8xf32>
    %10 = vector.multi_reduction <add>, %9, %cst_4 [3] : vector<8x1x8x8xf32> to vector<8x1x8xf32>
    %11 = vector.shape_cast %10 : vector<8x1x8xf32> to vector<8x1x8x1xf32>
    %cst_5 = arith.constant 9.99999996E-13 : f32
    %12 = vector.broadcast %cst_5 : f32 to vector<8x1x8x1xf32>
    %13 = arith.maximumf %11, %12 : vector<8x1x8x1xf32>
    %14 = math.rsqrt %13 : vector<8x1x8x1xf32>
    %c0_6 = arith.constant 0 : index
    %c0_7 = arith.constant 0 : index
    %c0_8 = arith.constant 0 : index
    %c0_9 = arith.constant 0 : index
    %15 = vector.load %arg2[%c0_6, %c0_7, %c0_8, %c0_9] : memref<8x1x8x4xf32, #tpu.memory_space<vmem>>, vector<8x1x8x4xf32>
    %16 = vector.broadcast %14 : vector<8x1x8x1xf32> to vector<8x1x8x4xf32>
    %17 = arith.mulf %16, %15 : vector<8x1x8x4xf32>
    %18 = vector.shape_cast %9 : vector<8x1x8x8xf32> to vector<8x8x8xf32>
    %19 = vector.shape_cast %17 : vector<8x1x8x4xf32> to vector<8x8x4xf32>
    "tpu.trace_start"() <{level = 10 : i32, message = "bij,bjf->bif"}> : () -> ()
    %cst_10 = arith.constant dense<0.000000e+00> : vector<8x8x4xf32>
    %20 = tpu.matmul %18, %19, %cst_10 {dimension_numbers = #tpu.dot_dimension_numbers<[2], [1], [1], [2], [0, 0, 0, 1, 1, 2], [0], [0]>} : vector<8x8x8xf32>, vector<8x8x4xf32>, vector<8x8x4xf32> -> vector<8x8x4xf32>
    "tpu.trace_stop"() : () -> ()
    %21 = vector.shape_cast %20 : vector<8x8x4xf32> to vector<8x1x8x4xf32>
    %22 = vector.broadcast %14 : vector<8x1x8x1xf32> to vector<8x1x8x4xf32>
    %23 = arith.mulf %22, %21 : vector<8x1x8x4xf32>
    %24 = vector.extract_strided_slice %23 {offsets = [0, 0, 0, 0], sizes = [8, 1, 8, 1], strides = [1, 1, 1, 1]} : vector<8x1x8x4xf32> to vector<8x1x8x1xf32>
    %c0_11 = arith.constant 0 : index
    %c0_12 = arith.constant 0 : index
    %c0_13 = arith.constant 0 : index
    %c0_14 = arith.constant 0 : index
    %25 = vector.load %arg3[%c0_11, %c0_12, %c0_13, %c0_14] : memref<4x8x8x128xf32, #tpu.memory_space<vmem>>, vector<1x8x8x128xf32>
    %26 = vector.shape_cast %25 : vector<1x8x8x128xf32> to vector<8x8x128xf32>
    %27 = vector.shape_cast %26 : vector<8x8x128xf32> to vector<8x1x8x128xf32>
    %28 = vector.broadcast %24 : vector<8x1x8x1xf32> to vector<8x1x8x128xf32>
    %29 = arith.mulf %28, %27 : vector<8x1x8x128xf32>
    %30 = vector.extract_strided_slice %23 {offsets = [0, 0, 0, 1], sizes = [8, 1, 8, 1], strides = [1, 1, 1, 1]} : vector<8x1x8x4xf32> to vector<8x1x8x1xf32>
    %c1 = arith.constant 1 : index
    %c0_15 = arith.constant 0 : index
    %c0_16 = arith.constant 0 : index
    %c0_17 = arith.constant 0 : index
    %31 = vector.load %arg3[%c1, %c0_15, %c0_16, %c0_17] : memref<4x8x8x128xf32, #tpu.memory_space<vmem>>, vector<1x8x8x128xf32>
    %32 = vector.shape_cast %31 : vector<1x8x8x128xf32> to vector<8x8x128xf32>
    %33 = vector.shape_cast %32 : vector<8x8x128xf32> to vector<8x1x8x128xf32>
    %34 = vector.broadcast %30 : vector<8x1x8x1xf32> to vector<8x1x8x128xf32>
    %35 = arith.mulf %34, %33 : vector<8x1x8x128xf32>
    %36 = arith.addf %29, %35 : vector<8x1x8x128xf32>
    %37 = vector.extract_strided_slice %23 {offsets = [0, 0, 0, 2], sizes = [8, 1, 8, 1], strides = [1, 1, 1, 1]} : vector<8x1x8x4xf32> to vector<8x1x8x1xf32>
    %c2 = arith.constant 2 : index
    %c0_18 = arith.constant 0 : index
    %c0_19 = arith.constant 0 : index
    %c0_20 = arith.constant 0 : index
    %38 = vector.load %arg3[%c2, %c0_18, %c0_19, %c0_20] : memref<4x8x8x128xf32, #tpu.memory_space<vmem>>, vector<1x8x8x128xf32>
    %39 = vector.shape_cast %38 : vector<1x8x8x128xf32> to vector<8x8x128xf32>
    %40 = vector.shape_cast %39 : vector<8x8x128xf32> to vector<8x1x8x128xf32>
    %41 = vector.broadcast %37 : vector<8x1x8x1xf32> to vector<8x1x8x128xf32>
    %42 = arith.mulf %41, %40 : vector<8x1x8x128xf32>
    %43 = arith.addf %36, %42 : vector<8x1x8x128xf32>
    %44 = vector.extract_strided_slice %23 {offsets = [0, 0, 0, 3], sizes = [8, 1, 8, 1], strides = [1, 1, 1, 1]} : vector<8x1x8x4xf32> to vector<8x1x8x1xf32>
    %c3 = arith.constant 3 : index
    %c0_21 = arith.constant 0 : index
    %c0_22 = arith.constant 0 : index
    %c0_23 = arith.constant 0 : index
    %45 = vector.load %arg3[%c3, %c0_21, %c0_22, %c0_23] : memref<4x8x8x128xf32, #tpu.memory_space<vmem>>, vector<1x8x8x128xf32>
    %46 = vector.shape_cast %45 : vector<1x8x8x128xf32> to vector<8x8x128xf32>
    %47 = vector.shape_cast %46 : vector<8x8x128xf32> to vector<8x1x8x128xf32>
    %48 = vector.broadcast %44 : vector<8x1x8x1xf32> to vector<8x1x8x128xf32>
    %49 = arith.mulf %48, %47 : vector<8x1x8x128xf32>
    %50 = arith.addf %43, %49 : vector<8x1x8x128xf32>
    %cst_24 = arith.constant dense<0.000000e+00> : vector<8x1x128xf32>
    %51 = vector.multi_reduction <add>, %50, %cst_24 [2] : vector<8x1x8x128xf32> to vector<8x1x128xf32>
    %c0_25 = arith.constant 0 : index
    %c0_26 = arith.constant 0 : index
    %52 = vector.load %arg4[%c0_25, %c0_26] : memref<32x128xf32, #tpu.memory_space<vmem>>, vector<32x128xf32>
    %c0_27 = arith.constant 0 : index
    %c0_28 = arith.constant 0 : index
    %53 = vector.load %arg5[%c0_27, %c0_28] : memref<1x128xf32, #tpu.memory_space<vmem>>, vector<1x128xf32>
    %cst_29 = arith.constant 0.000000e+00 : f32
    %54 = vector.broadcast %cst_29 : f32 to vector<1x32xf32>
    %cst_30 = arith.constant 0.000000e+00 : f32
    %55 = vector.broadcast %cst_30 : f32 to vector<1x32xf32>
    %56 = vector.extract_strided_slice %51 {offsets = [0, 0, 0], sizes = [1, 1, 128], strides = [1, 1, 1]} : vector<8x1x128xf32> to vector<1x1x128xf32>
    %57 = vector.shape_cast %56 : vector<1x1x128xf32> to vector<1x128xf32>
    %58 = arith.addf %57, %53 : vector<1x128xf32>
    %cst_31 = arith.constant dense<0.000000e+00> : vector<1x128xf32>
    %59 = tpu.matmul %54, %52, %cst_31 {dimension_numbers = #tpu.dot_dimension_numbers<[1], [0], [0], [1], [0, 0, 1, 1], [], []>} : vector<1x32xf32>, vector<32x128xf32>, vector<1x128xf32> -> vector<1x128xf32>
    %60 = arith.addf %58, %59 : vector<1x128xf32>
    %61 = arith.negf %60 : vector<1x128xf32>
    %62 = math.exp %61 : vector<1x128xf32>
    %cst_32 = arith.constant 1.000000e+00 : f32
    %63 = vector.broadcast %cst_32 : f32 to vector<1x128xf32>
    %64 = arith.addf %63, %62 : vector<1x128xf32>
    %65 = arith.divf %63, %64 : vector<1x128xf32>
    %66 = math.tanh %60 : vector<1x128xf32>
    %67 = vector.extract_strided_slice %65 {offsets = [0, 0], sizes = [1, 32], strides = [1, 1]} : vector<1x128xf32> to vector<1x32xf32>
    %68 = vector.extract_strided_slice %65 {offsets = [0, 32], sizes = [1, 32], strides = [1, 1]} : vector<1x128xf32> to vector<1x32xf32>
    %69 = vector.extract_strided_slice %66 {offsets = [0, 64], sizes = [1, 32], strides = [1, 1]} : vector<1x128xf32> to vector<1x32xf32>
    %70 = vector.extract_strided_slice %65 {offsets = [0, 96], sizes = [1, 32], strides = [1, 1]} : vector<1x128xf32> to vector<1x32xf32>
    %71 = arith.mulf %68, %55 : vector<1x32xf32>
    %72 = arith.mulf %67, %69 : vector<1x32xf32>
    %73 = arith.addf %71, %72 : vector<1x32xf32>
    %74 = math.tanh %73 : vector<1x32xf32>
    %75 = arith.mulf %70, %74 : vector<1x32xf32>
    %76 = vector.extract_strided_slice %51 {offsets = [1, 0, 0], sizes = [1, 1, 128], strides = [1, 1, 1]} : vector<8x1x128xf32> to vector<1x1x128xf32>
    %77 = vector.shape_cast %76 : vector<1x1x128xf32> to vector<1x128xf32>
    %78 = arith.addf %77, %53 : vector<1x128xf32>
    %cst_33 = arith.constant dense<0.000000e+00> : vector<1x128xf32>
    %79 = tpu.matmul %75, %52, %cst_33 {dimension_numbers = #tpu.dot_dimension_numbers<[1], [0], [0], [1], [0, 0, 1, 1], [], []>} : vector<1x32xf32>, vector<32x128xf32>, vector<1x128xf32> -> vector<1x128xf32>
    %80 = arith.addf %78, %79 : vector<1x128xf32>
    %81 = arith.negf %80 : vector<1x128xf32>
    %82 = math.exp %81 : vector<1x128xf32>
    %cst_34 = arith.constant 1.000000e+00 : f32
    %83 = vector.broadcast %cst_34 : f32 to vector<1x128xf32>
    %84 = arith.addf %83, %82 : vector<1x128xf32>
    %85 = arith.divf %83, %84 : vector<1x128xf32>
    %86 = math.tanh %80 : vector<1x128xf32>
    %87 = vector.extract_strided_slice %85 {offsets = [0, 0], sizes = [1, 32], strides = [1, 1]} : vector<1x128xf32> to vector<1x32xf32>
    %88 = vector.extract_strided_slice %85 {offsets = [0, 32], sizes = [1, 32], strides = [1, 1]} : vector<1x128xf32> to vector<1x32xf32>
    %89 = vector.extract_strided_slice %86 {offsets = [0, 64], sizes = [1, 32], strides = [1, 1]} : vector<1x128xf32> to vector<1x32xf32>
    %90 = vector.extract_strided_slice %85 {offsets = [0, 96], sizes = [1, 32], strides = [1, 1]} : vector<1x128xf32> to vector<1x32xf32>
    %91 = arith.mulf %88, %73 : vector<1x32xf32>
    %92 = arith.mulf %87, %89 : vector<1x32xf32>
    %93 = arith.addf %91, %92 : vector<1x32xf32>
    %94 = math.tanh %93 : vector<1x32xf32>
    %95 = arith.mulf %90, %94 : vector<1x32xf32>
    %96 = vector.extract_strided_slice %51 {offsets = [2, 0, 0], sizes = [1, 1, 128], strides = [1, 1, 1]} : vector<8x1x128xf32> to vector<1x1x128xf32>
    %97 = vector.shape_cast %96 : vector<1x1x128xf32> to vector<1x128xf32>
    %98 = arith.addf %97, %53 : vector<1x128xf32>
    %cst_35 = arith.constant dense<0.000000e+00> : vector<1x128xf32>
    %99 = tpu.matmul %95, %52, %cst_35 {dimension_numbers = #tpu.dot_dimension_numbers<[1], [0], [0], [1], [0, 0, 1, 1], [], []>} : vector<1x32xf32>, vector<32x128xf32>, vector<1x128xf32> -> vector<1x128xf32>
    %100 = arith.addf %98, %99 : vector<1x128xf32>
    %101 = arith.negf %100 : vector<1x128xf32>
    %102 = math.exp %101 : vector<1x128xf32>
    %cst_36 = arith.constant 1.000000e+00 : f32
    %103 = vector.broadcast %cst_36 : f32 to vector<1x128xf32>
    %104 = arith.addf %103, %102 : vector<1x128xf32>
    %105 = arith.divf %103, %104 : vector<1x128xf32>
    %106 = math.tanh %100 : vector<1x128xf32>
    %107 = vector.extract_strided_slice %105 {offsets = [0, 0], sizes = [1, 32], strides = [1, 1]} : vector<1x128xf32> to vector<1x32xf32>
    %108 = vector.extract_strided_slice %105 {offsets = [0, 32], sizes = [1, 32], strides = [1, 1]} : vector<1x128xf32> to vector<1x32xf32>
    %109 = vector.extract_strided_slice %106 {offsets = [0, 64], sizes = [1, 32], strides = [1, 1]} : vector<1x128xf32> to vector<1x32xf32>
    %110 = vector.extract_strided_slice %105 {offsets = [0, 96], sizes = [1, 32], strides = [1, 1]} : vector<1x128xf32> to vector<1x32xf32>
    %111 = arith.mulf %108, %93 : vector<1x32xf32>
    %112 = arith.mulf %107, %109 : vector<1x32xf32>
    %113 = arith.addf %111, %112 : vector<1x32xf32>
    %114 = math.tanh %113 : vector<1x32xf32>
    %115 = arith.mulf %110, %114 : vector<1x32xf32>
    %116 = vector.extract_strided_slice %51 {offsets = [3, 0, 0], sizes = [1, 1, 128], strides = [1, 1, 1]} : vector<8x1x128xf32> to vector<1x1x128xf32>
    %117 = vector.shape_cast %116 : vector<1x1x128xf32> to vector<1x128xf32>
    %118 = arith.addf %117, %53 : vector<1x128xf32>
    %cst_37 = arith.constant dense<0.000000e+00> : vector<1x128xf32>
    %119 = tpu.matmul %115, %52, %cst_37 {dimension_numbers = #tpu.dot_dimension_numbers<[1], [0], [0], [1], [0, 0, 1, 1], [], []>} : vector<1x32xf32>, vector<32x128xf32>, vector<1x128xf32> -> vector<1x128xf32>
    %120 = arith.addf %118, %119 : vector<1x128xf32>
    %121 = arith.negf %120 : vector<1x128xf32>
    %122 = math.exp %121 : vector<1x128xf32>
    %cst_38 = arith.constant 1.000000e+00 : f32
    %123 = vector.broadcast %cst_38 : f32 to vector<1x128xf32>
    %124 = arith.addf %123, %122 : vector<1x128xf32>
    %125 = arith.divf %123, %124 : vector<1x128xf32>
    %126 = math.tanh %120 : vector<1x128xf32>
    %127 = vector.extract_strided_slice %125 {offsets = [0, 0], sizes = [1, 32], strides = [1, 1]} : vector<1x128xf32> to vector<1x32xf32>
    %128 = vector.extract_strided_slice %125 {offsets = [0, 32], sizes = [1, 32], strides = [1, 1]} : vector<1x128xf32> to vector<1x32xf32>
    %129 = vector.extract_strided_slice %126 {offsets = [0, 64], sizes = [1, 32], strides = [1, 1]} : vector<1x128xf32> to vector<1x32xf32>
    %130 = vector.extract_strided_slice %125 {offsets = [0, 96], sizes = [1, 32], strides = [1, 1]} : vector<1x128xf32> to vector<1x32xf32>
    %131 = arith.mulf %128, %113 : vector<1x32xf32>
    %132 = arith.mulf %127, %129 : vector<1x32xf32>
    %133 = arith.addf %131, %132 : vector<1x32xf32>
    %134 = math.tanh %133 : vector<1x32xf32>
    %135 = arith.mulf %130, %134 : vector<1x32xf32>
    %136 = vector.extract_strided_slice %51 {offsets = [4, 0, 0], sizes = [1, 1, 128], strides = [1, 1, 1]} : vector<8x1x128xf32> to vector<1x1x128xf32>
    %137 = vector.shape_cast %136 : vector<1x1x128xf32> to vector<1x128xf32>
    %138 = arith.addf %137, %53 : vector<1x128xf32>
    %cst_39 = arith.constant dense<0.000000e+00> : vector<1x128xf32>
    %139 = tpu.matmul %135, %52, %cst_39 {dimension_numbers = #tpu.dot_dimension_numbers<[1], [0], [0], [1], [0, 0, 1, 1], [], []>} : vector<1x32xf32>, vector<32x128xf32>, vector<1x128xf32> -> vector<1x128xf32>
    %140 = arith.addf %138, %139 : vector<1x128xf32>
    %141 = arith.negf %140 : vector<1x128xf32>
    %142 = math.exp %141 : vector<1x128xf32>
    %cst_40 = arith.constant 1.000000e+00 : f32
    %143 = vector.broadcast %cst_40 : f32 to vector<1x128xf32>
    %144 = arith.addf %143, %142 : vector<1x128xf32>
    %145 = arith.divf %143, %144 : vector<1x128xf32>
    %146 = math.tanh %140 : vector<1x128xf32>
    %147 = vector.extract_strided_slice %145 {offsets = [0, 0], sizes = [1, 32], strides = [1, 1]} : vector<1x128xf32> to vector<1x32xf32>
    %148 = vector.extract_strided_slice %145 {offsets = [0, 32], sizes = [1, 32], strides = [1, 1]} : vector<1x128xf32> to vector<1x32xf32>
    %149 = vector.extract_strided_slice %146 {offsets = [0, 64], sizes = [1, 32], strides = [1, 1]} : vector<1x128xf32> to vector<1x32xf32>
    %150 = vector.extract_strided_slice %145 {offsets = [0, 96], sizes = [1, 32], strides = [1, 1]} : vector<1x128xf32> to vector<1x32xf32>
    %151 = arith.mulf %148, %133 : vector<1x32xf32>
    %152 = arith.mulf %147, %149 : vector<1x32xf32>
    %153 = arith.addf %151, %152 : vector<1x32xf32>
    %154 = math.tanh %153 : vector<1x32xf32>
    %155 = arith.mulf %150, %154 : vector<1x32xf32>
    %156 = vector.extract_strided_slice %51 {offsets = [5, 0, 0], sizes = [1, 1, 128], strides = [1, 1, 1]} : vector<8x1x128xf32> to vector<1x1x128xf32>
    %157 = vector.shape_cast %156 : vector<1x1x128xf32> to vector<1x128xf32>
    %158 = arith.addf %157, %53 : vector<1x128xf32>
    %cst_41 = arith.constant dense<0.000000e+00> : vector<1x128xf32>
    %159 = tpu.matmul %155, %52, %cst_41 {dimension_numbers = #tpu.dot_dimension_numbers<[1], [0], [0], [1], [0, 0, 1, 1], [], []>} : vector<1x32xf32>, vector<32x128xf32>, vector<1x128xf32> -> vector<1x128xf32>
    %160 = arith.addf %158, %159 : vector<1x128xf32>
    %161 = arith.negf %160 : vector<1x128xf32>
    %162 = math.exp %161 : vector<1x128xf32>
    %cst_42 = arith.constant 1.000000e+00 : f32
    %163 = vector.broadcast %cst_42 : f32 to vector<1x128xf32>
    %164 = arith.addf %163, %162 : vector<1x128xf32>
    %165 = arith.divf %163, %164 : vector<1x128xf32>
    %166 = math.tanh %160 : vector<1x128xf32>
    %167 = vector.extract_strided_slice %165 {offsets = [0, 0], sizes = [1, 32], strides = [1, 1]} : vector<1x128xf32> to vector<1x32xf32>
    %168 = vector.extract_strided_slice %165 {offsets = [0, 32], sizes = [1, 32], strides = [1, 1]} : vector<1x128xf32> to vector<1x32xf32>
    %169 = vector.extract_strided_slice %166 {offsets = [0, 64], sizes = [1, 32], strides = [1, 1]} : vector<1x128xf32> to vector<1x32xf32>
    %170 = vector.extract_strided_slice %165 {offsets = [0, 96], sizes = [1, 32], strides = [1, 1]} : vector<1x128xf32> to vector<1x32xf32>
    %171 = arith.mulf %168, %153 : vector<1x32xf32>
    %172 = arith.mulf %167, %169 : vector<1x32xf32>
    %173 = arith.addf %171, %172 : vector<1x32xf32>
    %174 = math.tanh %173 : vector<1x32xf32>
    %175 = arith.mulf %170, %174 : vector<1x32xf32>
    %176 = vector.extract_strided_slice %51 {offsets = [6, 0, 0], sizes = [1, 1, 128], strides = [1, 1, 1]} : vector<8x1x128xf32> to vector<1x1x128xf32>
    %177 = vector.shape_cast %176 : vector<1x1x128xf32> to vector<1x128xf32>
    %178 = arith.addf %177, %53 : vector<1x128xf32>
    %cst_43 = arith.constant dense<0.000000e+00> : vector<1x128xf32>
    %179 = tpu.matmul %175, %52, %cst_43 {dimension_numbers = #tpu.dot_dimension_numbers<[1], [0], [0], [1], [0, 0, 1, 1], [], []>} : vector<1x32xf32>, vector<32x128xf32>, vector<1x128xf32> -> vector<1x128xf32>
    %180 = arith.addf %178, %179 : vector<1x128xf32>
    %181 = arith.negf %180 : vector<1x128xf32>
    %182 = math.exp %181 : vector<1x128xf32>
    %cst_44 = arith.constant 1.000000e+00 : f32
    %183 = vector.broadcast %cst_44 : f32 to vector<1x128xf32>
    %184 = arith.addf %183, %182 : vector<1x128xf32>
    %185 = arith.divf %183, %184 : vector<1x128xf32>
    %186 = math.tanh %180 : vector<1x128xf32>
    %187 = vector.extract_strided_slice %185 {offsets = [0, 0], sizes = [1, 32], strides = [1, 1]} : vector<1x128xf32> to vector<1x32xf32>
    %188 = vector.extract_strided_slice %185 {offsets = [0, 32], sizes = [1, 32], strides = [1, 1]} : vector<1x128xf32> to vector<1x32xf32>
    %189 = vector.extract_strided_slice %186 {offsets = [0, 64], sizes = [1, 32], strides = [1, 1]} : vector<1x128xf32> to vector<1x32xf32>
    %190 = vector.extract_strided_slice %185 {offsets = [0, 96], sizes = [1, 32], strides = [1, 1]} : vector<1x128xf32> to vector<1x32xf32>
    %191 = arith.mulf %188, %173 : vector<1x32xf32>
    %192 = arith.mulf %187, %189 : vector<1x32xf32>
    %193 = arith.addf %191, %192 : vector<1x32xf32>
    %194 = math.tanh %193 : vector<1x32xf32>
    %195 = arith.mulf %190, %194 : vector<1x32xf32>
    %196 = vector.extract_strided_slice %51 {offsets = [7, 0, 0], sizes = [1, 1, 128], strides = [1, 1, 1]} : vector<8x1x128xf32> to vector<1x1x128xf32>
    %197 = vector.shape_cast %196 : vector<1x1x128xf32> to vector<1x128xf32>
    %198 = arith.addf %197, %53 : vector<1x128xf32>
    %cst_45 = arith.constant dense<0.000000e+00> : vector<1x128xf32>
    %199 = tpu.matmul %195, %52, %cst_45 {dimension_numbers = #tpu.dot_dimension_numbers<[1], [0], [0], [1], [0, 0, 1, 1], [], []>} : vector<1x32xf32>, vector<32x128xf32>, vector<1x128xf32> -> vector<1x128xf32>
    %200 = arith.addf %198, %199 : vector<1x128xf32>
    %201 = arith.negf %200 : vector<1x128xf32>
    %202 = math.exp %201 : vector<1x128xf32>
    %cst_46 = arith.constant 1.000000e+00 : f32
    %203 = vector.broadcast %cst_46 : f32 to vector<1x128xf32>
    %204 = arith.addf %203, %202 : vector<1x128xf32>
    %205 = arith.divf %203, %204 : vector<1x128xf32>
    %206 = math.tanh %200 : vector<1x128xf32>
    %207 = vector.extract_strided_slice %205 {offsets = [0, 0], sizes = [1, 32], strides = [1, 1]} : vector<1x128xf32> to vector<1x32xf32>
    %208 = vector.extract_strided_slice %205 {offsets = [0, 32], sizes = [1, 32], strides = [1, 1]} : vector<1x128xf32> to vector<1x32xf32>
    %209 = vector.extract_strided_slice %206 {offsets = [0, 64], sizes = [1, 32], strides = [1, 1]} : vector<1x128xf32> to vector<1x32xf32>
    %210 = vector.extract_strided_slice %205 {offsets = [0, 96], sizes = [1, 32], strides = [1, 1]} : vector<1x128xf32> to vector<1x32xf32>
    %211 = arith.mulf %208, %193 : vector<1x32xf32>
    %212 = arith.mulf %207, %209 : vector<1x32xf32>
    %213 = arith.addf %211, %212 : vector<1x32xf32>
    %214 = math.tanh %213 : vector<1x32xf32>
    %215 = arith.mulf %210, %214 : vector<1x32xf32>
    %c0_47 = arith.constant 0 : index
    %c0_48 = arith.constant 0 : index
    %216 = vector.load %arg6[%c0_47, %c0_48] : memref<32x16xf32, #tpu.memory_space<vmem>>, vector<32x16xf32>
    %cst_49 = arith.constant dense<0.000000e+00> : vector<1x16xf32>
    %217 = tpu.matmul %215, %216, %cst_49 {dimension_numbers = #tpu.dot_dimension_numbers<[1], [0], [0], [1], [0, 0, 1, 1], [], []>} : vector<1x32xf32>, vector<32x16xf32>, vector<1x16xf32> -> vector<1x16xf32>
    %c0_50 = arith.constant 0 : index
    %c0_51 = arith.constant 0 : index
    %218 = vector.load %arg7[%c0_50, %c0_51] : memref<1x16xf32, #tpu.memory_space<vmem>>, vector<1x16xf32>
    %219 = arith.addf %217, %218 : vector<1x16xf32>
    %220 = vector.extract_strided_slice %219 {offsets = [0, 0], sizes = [1, 8], strides = [1, 1]} : vector<1x16xf32> to vector<1x8xf32>
    %221 = vector.extract_strided_slice %219 {offsets = [0, 8], sizes = [1, 8], strides = [1, 1]} : vector<1x16xf32> to vector<1x8xf32>
    %222 = vector.shape_cast %220 : vector<1x8xf32> to vector<1x1x8xf32>
    %223 = vector.shape_cast %222 : vector<1x1x8xf32> to vector<1x1x8xf32>
    %224 = vector.broadcast %223 : vector<1x1x8xf32> to vector<1x8x8xf32>
    %225 = tpu.transpose %224, [0, 2, 1] : vector<1x8x8xf32> -> vector<1x8x8xf32>
    %226 = vector.shape_cast %221 : vector<1x8xf32> to vector<1x1x8xf32>
    %227 = vector.broadcast %226 : vector<1x1x8xf32> to vector<1x8x8xf32>
    %228 = arith.addf %225, %227 : vector<1x8x8xf32>
    %229 = tpu.transpose %228, [0, 2, 1] : vector<1x8x8xf32> -> vector<1x8x8xf32>
    %230 = tpu.iota {dimensions = array<i32: 1>} : vector<1x8x8xi32>
    %231 = tpu.iota {dimensions = array<i32: 2>} : vector<1x8x8xi32>
    %232 = arith.cmpi slt, %230, %231 : vector<1x8x8xi32>
    %233 = arith.cmpf oge, %228, %229 : vector<1x8x8xf32>
    %234 = arith.andi %232, %233 : vector<1x8x8xi1>
    %cst_52 = arith.constant 0.000000e+00 : f32
    %235 = vector.broadcast %cst_52 : f32 to vector<1x8x8xf32>
    %236 = arith.cmpf ogt, %228, %235 : vector<1x8x8xf32>
    %237 = arith.andi %234, %236 : vector<1x8x8xi1>
    %238 = arith.cmpi sgt, %230, %231 : vector<1x8x8xi32>
    %239 = arith.cmpf ogt, %228, %229 : vector<1x8x8xf32>
    %240 = arith.andi %238, %239 : vector<1x8x8xi1>
    %cst_53 = arith.constant 0.000000e+00 : f32
    %241 = vector.broadcast %cst_53 : f32 to vector<1x8x8xf32>
    %242 = arith.cmpf oge, %228, %241 : vector<1x8x8xf32>
    %243 = arith.andi %240, %242 : vector<1x8x8xi1>
    %244 = arith.ori %237, %243 : vector<1x8x8xi1>
    %cst_54 = arith.constant 0.000000e+00 : f32
    %245 = vector.broadcast %cst_54 : f32 to vector<1x8x8xf32>
    %246 = arith.select %244, %228, %245 : vector<1x8x8xi1>, vector<1x8x8xf32>
    %247 = math.absf %246 : vector<1x8x8xf32>
    %cst_55 = arith.constant dense<0.000000e+00> : vector<1x8xf32>
    %248 = vector.multi_reduction <add>, %247, %cst_55 [2] : vector<1x8x8xf32> to vector<1x8xf32>
    %249 = vector.shape_cast %248 : vector<1x8xf32> to vector<1x8x1xf32>
    %cst_56 = arith.constant 9.99999996E-13 : f32
    %250 = vector.broadcast %cst_56 : f32 to vector<1x8x1xf32>
    %251 = arith.maximumf %249, %250 : vector<1x8x1xf32>
    %252 = tpu.reciprocal %251 {approx = true} : vector<1x8x1xf32> -> vector<1x8x1xf32>
    %253 = vector.broadcast %252 : vector<1x8x1xf32> to vector<1x8x8xf32>
    %254 = arith.mulf %246, %253 : vector<1x8x8xf32>
    %c0_57 = arith.constant 0 : index
    %c0_58 = arith.constant 0 : index
    %c0_59 = arith.constant 0 : index
    %255 = vector.load %arg8[%c0_57, %c0_58, %c0_59] : memref<1x8x8xf32, #tpu.memory_space<vmem>>, vector<1x8x8xf32>
    tpu.vector_store %arg8[%c0_57, %c0_58, %c0_59], %254 {strides = array<i32>} : memref<1x8x8xf32, #tpu.memory_space<vmem>>, vector<1x8x8xf32>,
    return
  }
  func.func @transform_0(%arg0: i32) -> (i32, i32, i32, i32) {
    %c0_i32 = arith.constant 0 : i32
    %c0_i32_0 = arith.constant 0 : i32
    %c0_i32_1 = arith.constant 0 : i32
    %c0_i32_2 = arith.constant 0 : i32
    return %c0_i32, %arg0, %c0_i32_0, %c0_i32_1 : i32, i32, i32, i32
  }
  func.func @transform_1(%arg0: i32) -> (i32, i32, i32, i32) {
    %c0_i32 = arith.constant 0 : i32
    %c0_i32_0 = arith.constant 0 : i32
    %c0_i32_1 = arith.constant 0 : i32
    %c0_i32_2 = arith.constant 0 : i32
    return %c0_i32, %arg0, %c0_i32_0, %c0_i32_1 : i32, i32, i32, i32
  }
  func.func @transform_2(%arg0: i32) -> (i32, i32, i32, i32) {
    %c0_i32 = arith.constant 0 : i32
    %c0_i32_0 = arith.constant 0 : i32
    %c0_i32_1 = arith.constant 0 : i32
    %c0_i32_2 = arith.constant 0 : i32
    %c0_i32_3 = arith.constant 0 : i32
    return %c0_i32, %c0_i32_0, %c0_i32_1, %c0_i32_2 : i32, i32, i32, i32
  }
  func.func @transform_3(%arg0: i32) -> (i32, i32) {
    %c0_i32 = arith.constant 0 : i32
    %c0_i32_0 = arith.constant 0 : i32
    %c0_i32_1 = arith.constant 0 : i32
    return %c0_i32, %c0_i32_0 : i32, i32
  }
  func.func @transform_4(%arg0: i32) -> (i32, i32) {
    %c0_i32 = arith.constant 0 : i32
    %c0_i32_0 = arith.constant 0 : i32
    %c0_i32_1 = arith.constant 0 : i32
    return %c0_i32, %c0_i32_0 : i32, i32
  }
  func.func @transform_5(%arg0: i32) -> (i32, i32) {
    %c0_i32 = arith.constant 0 : i32
    %c0_i32_0 = arith.constant 0 : i32
    %c0_i32_1 = arith.constant 0 : i32
    return %c0_i32, %c0_i32_0 : i32, i32
  }
  func.func @transform_6(%arg0: i32) -> (i32, i32) {
    %c0_i32 = arith.constant 0 : i32
    %c0_i32_0 = arith.constant 0 : i32
    %c0_i32_1 = arith.constant 0 : i32
    return %c0_i32, %c0_i32_0 : i32, i32
  }
  func.func @transform_7(%arg0: i32) -> (i32, i32, i32) {
    %c0_i32 = arith.constant 0 : i32
    %c0_i32_0 = arith.constant 0 : i32
    %c0_i32_1 = arith.constant 0 : i32
    return %arg0, %c0_i32, %c0_i32_0 : i32, i32, i32
  }
}

</mosaic_0001>

<bundles_post_ra>
// kernel: generator_forward.1
= control target key start
LH: loop header
LB: loop body
LE: loop exit
PB: predicated region body
PF: predicated region fallthrough
CT: control target
= control target key end

     0   :  { %12 = vsyncpa [#allocation5], 0  ;;  %s3552_s0 = inlined_call_operand.vmem [shape: f32[8,2,8,8], index: 0, kind: input, shape index: {}]   ;;  %s3553_s1 = inlined_call_operand.vmem [shape: f32[8,2,8,4], index: 1, kind: input, shape index: {}]   ;;  %s3554_s2 = inlined_call_operand.vmem [shape: f32[4,8,8,128], index: 2, kind: input, shape index: {}]   ;;  %s3555_s3 = inlined_call_operand.vmem [shape: f32[32,128], index: 3, kind: input, shape index: {}]   ;;  %s3556_s4 = inlined_call_operand.vmem [shape: f32[1,128], index: 4, kind: input, shape index: {}]   ;;  %s3557_s5 = inlined_call_operand.vmem [shape: f32[32,16], index: 5, kind: input, shape index: {}]   ;;  %s3558_s6 = inlined_call_operand.vmem [shape: f32[1,16], index: 6, kind: input, shape index: {}]   ;;  %s3559_s7 = inlined_call_operand.hbm [shape: f32[2,8,8], index: 7, kind: output, shape index: {}]  }
   0x1   :  { %14 = vsyncpa [#allocation5 + $0x1], 0  ;;  %s2988_s24 = smov 0   ;;  %s2990_s25 = smov 0  }
   0x2   :  { %s2992_s26 = smov 0   ;;  %s2994_s27 = smov 0  }
   0x3 LB: > { %s2450_s28 = sadd.s32 4294967295, %s2936_s27   ;;  %s2451_s29 = sadd.s32 4294967294, %s2936_s27   ;;  %s2936_s27 = sphi %s2994_s27, %s3568_s27   ;;  %s2932_s26 = sphi %s2992_s26, %s3567_s26   ;;  %s2928_s25 = sphi %s2990_s25, %s3566_s25   ;;  %s2924_s24 = sphi %s2988_s24, %s3565_s24  }
   0x4   : > { %s3011_s30 = sadd.s32 1, %s2936_s27   ;;  %s27_s8 = sadd.s32 1, %s2932_s26 }
   0x5   : > { %s24_s9 = ssub.s32 %s2936_s27, %s3011_s30  ;;  %p34_p0 = scmp.ne.s32.totalorder %s2932_s26, %s2928_s25 }
   0x6   : > { %p25_p1 = scmp.eq.s32.totalorder %s24_s9, 0  ;;  %p35_p2 = scmp.eq.s32.totalorder %s2936_s27, 0 }
   0x7   : > { %p195_p3 = scmp.eq.s32.totalorder %s2450_s28, 1  ;;  %p200_p4 = scmp.ne.s32.totalorder %s2928_s25, %s2924_s24 }
   0x8   : > { %s3024_s10 = scalar_select %p25_p1, %s2932_s26, %s27_s8  }
   0x9   : > { %p3026_p5 = por %p35_p2, %p34_p0  ;;  %p3030_p6 = por %p195_p3, %p34_p0 }
   0xa   : > { %p201_p7 = scmp.eq.s32.totalorder %s2451_s29, 1  ;;  %p3560_p9 = scmp.ge.s32.totalorder %s2936_s27, 2 }
   0xc   : > { %p3034_p8 = por %p201_p7, %p200_p4  ;;  %232 = sbr.rel (%p3560_p9) target bundleno = 33 (0x21), region = 36 }
  0x11   : > { %235 = sbr.rel (!%p3026_p5) target bundleno = 25 (0x19), region = 40  ;;  %s237_s14 = sand.u32 (%p3026_p5), 1, %s2932_s26  }
  0x12   : > { %s2455_s15 = sshll.u32 (%p3026_p5), %s2936_s27, 3  ;;  %s2454_s16 = sshll.u32 (%p3026_p5), %s237_s14, 6 }
  0x13   : > { %s241_s19 = scalar_lea.vmem (%p3026_p5), %s3552_s0, %s2455_s15  ;;  %s239_s20 = scalar_lea.vmem (%p3026_p5), [#allocation2], %s2454_s16 }
  0x14   : > { %v284_v0 = vld [vmem:[%s241_s19] sm:$0xff] (%p3026_p5)  ;;  %v286_v1 = vld [vmem:[%s241_s19 + $0x10] sm:$0xff] (%p3026_p5) }
  0x15   : > { %v288_v2 = vld [vmem:[%s241_s19 + $0x20] sm:$0xff] (%p3026_p5)  ;;  %285 = vst [vmem:[%s239_s20] sm:$0xff] (%p3026_p5), %v284_v0  ;;  %287 = vst [vmem:[%s239_s20 + $0x8] sm:$0xff] (%p3026_p5), %v286_v1  ;;  %v290_v3 = vld [vmem:[%s241_s19 + $0x30] sm:$0xff] (%p3026_p5) }
  0x16   : > { %289 = vst [vmem:[%s239_s20 + $0x10] sm:$0xff] %v288_v2  ;;  %v292_v4 = vld [vmem:[%s241_s19 + $0x40] sm:$0xff]  ;;  %v294_v5 = vld [vmem:[%s241_s19 + $0x50] sm:$0xff]  ;;  %291 = vst [vmem:[%s239_s20 + $0x18] sm:$0xff] %v290_v3 }
  0x17   : > { %293 = vst [vmem:[%s239_s20 + $0x20] sm:$0xff] %v292_v4  ;;  %295 = vst [vmem:[%s239_s20 + $0x28] sm:$0xff] %v294_v5  ;;  %v296_v6 = vld [vmem:[%s241_s19 + $0x60] sm:$0xff]  ;;  %v298_v7 = vld [vmem:[%s241_s19 + $0x70] sm:$0xff] }
  0x18   : > { %297 = vst [vmem:[%s239_s20 + $0x30] sm:$0xff] %v296_v6  ;;  %299 = vst [vmem:[%s239_s20 + $0x38] sm:$0xff] %v298_v7 }
  0x19 PF: > { %305 = sbr.rel (!%p3026_p5) target bundleno = 33 (0x21), region = 78  ;;  %s307_s21 = sand.u32 (%p3026_p5), 1, %s2932_s26  }
  0x1a   : > { %s2457_s22 = sshll.u32 (%p3026_p5), %s2936_s27, 3  ;;  %s2456_s23 = sshll.u32 (%p3026_p5), %s307_s21, 6 }
  0x1b   : > { %s311_s9 = scalar_lea.vmem (%p3026_p5), %s3553_s1, %s2457_s22  ;;  %s309_s14 = scalar_lea.vmem (%p3026_p5), [#allocation3], %s2456_s23 }
  0x1c   : > { %v354_v8 = vld [vmem:[%s311_s9] sm:$0xff] (%p3026_p5)  ;;  %v356_v9 = vld [vmem:[%s311_s9 + $0x10] sm:$0xff] (%p3026_p5) }
  0x1d   : > { %v358_v10 = vld [vmem:[%s311_s9 + $0x20] sm:$0xff] (%p3026_p5)  ;;  %355 = vst [vmem:[%s309_s14] sm:$0xff] (%p3026_p5), %v354_v8  ;;  %357 = vst [vmem:[%s309_s14 + $0x8] sm:$0xff] (%p3026_p5), %v356_v9  ;;  %v360_v11 = vld [vmem:[%s311_s9 + $0x30] sm:$0xff] (%p3026_p5) }
  0x1e   : > { %359 = vst [vmem:[%s309_s14 + $0x10] sm:$0xff] %v358_v10  ;;  %v362_v12 = vld [vmem:[%s311_s9 + $0x40] sm:$0xff]  ;;  %v364_v13 = vld [vmem:[%s311_s9 + $0x50] sm:$0xff]  ;;  %361 = vst [vmem:[%s309_s14 + $0x18] sm:$0xff] %v360_v11 }
  0x1f   : > { %363 = vst [vmem:[%s309_s14 + $0x20] sm:$0xff] %v362_v12  ;;  %365 = vst [vmem:[%s309_s14 + $0x28] sm:$0xff] %v364_v13  ;;  %v366_v14 = vld [vmem:[%s311_s9 + $0x60] sm:$0xff]  ;;  %v368_v15 = vld [vmem:[%s311_s9 + $0x70] sm:$0xff] }
  0x20   : > { %367 = vst [vmem:[%s309_s14 + $0x30] sm:$0xff] %v366_v14  ;;  %369 = vst [vmem:[%s309_s14 + $0x38] sm:$0xff] %v368_v15 }
  0x21 PF: > { %p2458_p10 = scmp.ge.s32.totalorder %s2936_s27, 1  ;;  %p374_p11 = scmp.lt.s32.totalorder %s2936_s27, 3 }
  0x23   : > { %p375_p12 = pnand %p2458_p10, %p374_p11 }
  0x24   : > { %s3058_s11 = sand.u32 (!%p375_p12), 1, %s2928_s25   ;;  %s2944_s8 = smov (!%p375_p12), 64  }
  0x25   : > { %378 = sbr.rel (%p375_p12) target bundleno = 6502 (0x1966), region = 116  ;;  %s2459_s15 = sshll.u32 (!%p375_p12), %s3058_s11, 6 }
  0x26   : > { %s3069_s16 = scalar_lea.vmem (!%p375_p12), [#allocation2], %s2459_s15  ;;  %s3094_s17 = scalar_lea.vmem (!%p375_p12), [#allocation3], %s2459_s15 }
  0x27   : > { %s2945_s9 = smov (!%p375_p12), 32   ;;  %s2946_s14 = smov (!%p375_p12), 120  }
  0x28   : > { %s2355_s22 = scalar_lea.sflag (!%p375_p12), [#allocation5], %s3058_s11  ;;  %s2947_s29 = smov (!%p375_p12), [#allocation4]  }
  0x2a   : > { %v423_v16 = vlaneseq  ;;  %v2938_v17 = vmov 0.0   ;;  %v429_v20 = vld [vmem:[%s3069_s16] sm:$0xff]  ;;  %v431_v21 = vld [vmem:[%s3069_s16 + $0x10] sm:$0xff]  ;;  %vm445_vm1 = vcmask 64512   ;;  %vm2939_vm2 = vmmov 0   ;;  %v3125_v53 = vld [vmem:[%s3555_s3 + $0x18] sm:$0xff] }
  0x2b   : > { %2575 = vmatprep.subr.mxu1 %v2938_v17  ;;  %2585 = vmatprep.subr.mxu0 %v2938_v17  ;;  %v433_v22 = vld [vmem:[%s3069_s16 + $0x20] sm:$0xff]  ;;  %v435_v23 = vld [vmem:[%s3069_s16 + $0x30] sm:$0xff]  ;;  %v3140_v55 = vld [vmem:[%s3555_s3 + $0x8] sm:$0xff]  ;;  %v2940_v57 = vmov 1   ;;  %v2941_v58 = vmov 0   ;;  %v2942_v0 = vmov 2  }
  0x2c   : > { %v3063_v18 = vshrl.u32 %v423_v16, 7  ;;  %v3065_v19 = vand.u32 127, %v423_v16  ;;  %2577 = vmatprep.mubr.msk.f32.mxu1 %vm2939_vm2, %v2938_v17  ;;  %2587 = vmatprep.mubr.msk.f32.mxu0 %vm2939_vm2, %v2938_v17  ;;  %v486_v41 = vld [vmem:[%s3094_s17] sm:$0xff]  ;;  %v488_v45 = vld [vmem:[%s3094_s17 + $0x10] sm:$0xff]  ;;  %v2943_v3 = vmov 3   ;;  %vm1375_vm3 = vcmask 261120  }
  0x2d   : > { %v490_v46 = vld [vmem:[%s3094_s17 + $0x20] sm:$0xff]  ;;  %v492_v51 = vld [vmem:[%s3094_s17 + $0x30] sm:$0xff]  ;;  %2763 = vset.pattern.permute.xlu1 %v2940_v57  ;;  %2762 = vset.pattern.permute.xlu0 %v2941_v58 }
  0x2e   : > { %vm427_vm0 = vcmp.eq.s32.totalorder %v3063_v18, %v3065_v19  ;;  %v3131_v54 = vld [vmem:[%s3555_s3 + $0x10] sm:$0xff]  ;;  %v3147_v56 = vld [vmem:[%s3555_s3] sm:$0xff]  ;;  %vm2334_vm4 = vcmp.lt.s32.totalorder %v3063_v18, %v3065_v19  ;;  %vm2339_vm5 = vcmp.gt.s32.totalorder %v3063_v18, %v3065_v19 }
  0x2f   : > { %v3078_v24 = vsel %vm427_vm0, 1.0, %v2938_v17  ;;  %v2470_v9 = vld [vmem:[%s3554_s2 + $0x40] sm:$0xff] }
  0x30   : > { %v437_v25 = vadd.f32 %v429_v20, %v3078_v24  ;;  %v439_v26 = vadd.f32 %v431_v21, %v3078_v24  ;;  %v441_v27 = vadd.f32 %v433_v22, %v3078_v24  ;;  %v443_v28 = vadd.f32 %v435_v23, %v3078_v24  ;;  %v1094_v10 = vld [vmem:[%s3554_s2] sm:$0xff] }
  0x31   : > { %v2478_v12 = vld [vmem:[%s3554_s2 + $0x80] sm:$0xff] }
  0x32   : > { %v446_v29 = vsel %vm445_vm1, %v437_v25, 0.0  ;;  %v458_v30 = vsel %vm445_vm1, %v441_v27, 0.0  ;;  %v452_v31 = vsel %vm445_vm1, %v439_v26, 0.0  ;;  %v464_v32 = vsel %vm445_vm1, %v443_v28, 0.0  ;;  %v2486_v20 = vld [vmem:[%s3554_s2 + $0xc0] sm:$0xff] }
  0x33   : > { %447 = vadd.xlane.f32.xlu0 %v446_v29  ;;  %459 = vadd.xlane.f32.xlu1 %v458_v30 }
  0x37   : > { %453 = vadd.xlane.f32.xlu0 %v452_v31  ;;  %465 = vadd.xlane.f32.xlu1 %v464_v32  ;;  %v3190_v32 = vld [vmem:[%s3556_s4] sm:$0x1] }
  0xbc   : > { %v448_v33 = vpop.xlane.xlu0 %447  ;;  %v460_v34 = vpop.xlane.xlu1 %459 }
  0xbd   : > { %v470_v35 = vmax.f32 %v448_v33, 1e-12  ;;  %v474_v36 = vmax.f32 %v460_v34, 1e-12 }
  0xbf   : > { %2793 = vrsqrt.f32 %v470_v35 }
  0xc0   : > { %v454_v37 = vpop.xlane.xlu0 %453  ;;  %v466_v38 = vpop.xlane.xlu1 %465  ;;  %2795 = vrsqrt.f32 %v474_v36 }
  0xc1   : > { %v472_v39 = vmax.f32 %v454_v37, 1e-12  ;;  %v476_v40 = vmax.f32 %v466_v38, 1e-12 }
  0xc3   : > { %2797 = vrsqrt.f32 %v472_v39 }
  0xc4   : > { %2799 = vrsqrt.f32 %v476_v40 }
  0xcc   : > { %v2794_v42 = vpop.eup %2793 }
  0xcd   : > { %v494_v43 = vmul.f32 %v2794_v42, %v486_v41  ;;  %v3097_v44 = vpop.eup %2795 }
  0xce   : > { %v498_v49 = vmul.f32 %v3097_v44, %v490_v46 }
  0xcf   : > { %2576 = vmatpush3.msra.mxu1 %v494_v43  ;;  %v430_v43 = vld [vmem:[%s3069_s16 + $0x8] sm:$0xff] }
  0xd0   : > { %v3101_v47 = vpop.eup %2797  ;;  %2578 = vmatmul.mubr.msk.f32.vlgmr.msra.gmra.mxu1 %vm445_vm1, %v437_v25  ;;  %2580 = vmatprep.subr.mxu1 %v2938_v17 }
  0xd1   : > { %v496_v48 = vmul.f32 %v3101_v47, %v488_v45  ;;  %2582 = vmatprep.mubr.msk.f32.mxu1 %vm2939_vm2, %v2938_v17  ;;  %v3109_v50 = vpop.eup %2799  ;;  %v438_v45 = vadd.f32 %v430_v43, %v3078_v24 }
  0xd2   : > { %v500_v52 = vmul.f32 %v3109_v50, %v492_v51 }
  0xd3   : > { %2586 = vmatpush3.msra.mxu0 %v496_v48  ;;  %v449_v46 = vsel %vm445_vm1, %v438_v45, 0.0  ;;  %v434_v48 = vld [vmem:[%s3069_s16 + $0x28] sm:$0xff] }
  0xd4   : > { %2588 = vmatmul.mubr.msk.f32.vlgmr.msra.gmra.mxu0 %vm445_vm1, %v439_v26  ;;  %2595 = vmatprep.subr.mxu0 %v2938_v17  ;;  %v442_v51 = vadd.f32 %v434_v48, %v3078_v24  ;;  %v2479_v48 = vld [vmem:[%s3554_s2 + $0x88] sm:$0xff] }
  0xd5   : > { %2596 = vmatpush3.msra.mxu0 %v498_v49  ;;  %2597 = vmatprep.mubr.msk.f32.mxu0 %vm2939_vm2, %v2938_v17  ;;  %v436_v49 = vld [vmem:[%s3069_s16 + $0x38] sm:$0xff] }
  0xd6   : > { %2605 = vmatprep.subr.mxu0 %v2938_v17 }
  0xd8   : > { %2598 = vmatmul.mubr.msk.f32.vlgmr.msra.gmra.mxu0 %vm445_vm1, %v441_v27 }
  0xd9   : > { %2606 = vmatpush3.msra.mxu0 %v500_v52  ;;  %2607 = vmatprep.mubr.msk.f32.mxu0 %vm2939_vm2, %v2938_v17  ;;  %v461_v52 = vsel %vm445_vm1, %v442_v51, 0.0 }
  0xda   : > { %2615 = vmatprep.subr.mxu0 %v2938_v17 }
  0xdc   : > { %2608 = vmatmul.mubr.msk.f32.vlgmr.msra.gmra.mxu0 %vm445_vm1, %v443_v28 }
  0xdd   : > { %2616 = vmatpush3.msra.mxu0 %v3125_v53  ;;  %2623 = vmatprep.mubr.msk.f32.mxu0 %vm2939_vm2, %v2938_v17 }
  0xde   : > { %2617 = vmatprep.subr.mxu0 %v2938_v17 }
  0xdf   : > { %2618 = vmatpush3.msra.mxu0 %v3131_v54 }
  0xe0   : > { %2619 = vmatprep.subr.mxu0 %v2938_v17 }
  0xe1   : > { %2620 = vmatpush3.msra.mxu0 %v3140_v55 }
  0xe2   : > { %2621 = vmatprep.subr.mxu0 %v2938_v17 }
  0xe3   : > { %2622 = vmatpush3.msra.mxu0 %v3147_v56 }
  0xe4   : > { %2624 = vmatmul.mubr.f32.vlgmr.msra.gmra.mxu0 %v2938_v17  ;;  %2637 = vmatprep.subr.mxu0 %v2938_v17 }
  0xe5   : > { %2638 = vmatpush3.msra.mxu0 %v3125_v53  ;;  %2645 = vmatprep.mubr.msk.f32.mxu0 %vm2939_vm2, %v2938_v17 }
  0xe6   : > { %2639 = vmatprep.subr.mxu0 %v2938_v17 }
  0xe7   : > { %2640 = vmatpush3.msra.mxu0 %v3131_v54 }
  0xe8   : > { %2641 = vmatprep.subr.mxu0 %v2938_v17 }
  0xe9   : > { %2642 = vmatpush3.msra.mxu0 %v3140_v55 }
  0xea   : > { %2643 = vmatprep.subr.mxu0 %v2938_v17 }
  0xeb   : > { %2644 = vmatpush3.msra.mxu0 %v3147_v56 }
  0xec   : > { %2659 = vmatprep.subr.mxu0 %v2938_v17 }
 0x190   : > { %v571_v59 = vpop.f32.mrf.mxu1 }
 0x191   : > { %v1086_v60 = vmul.f32 %v2794_v42, %v571_v59  ;;  %v444_v59 = vadd.f32 %v436_v49, %v3078_v24 }
 0x192   : > { %v2579_v61 = vpop.f32.mrf.mxu1 }
 0x193   : > { %1160 = vperm.xlu1 %2763, %v1086_v60   ;;  %1104 = vperm.xlu0 %2762, %v1086_v60  }
 0x194   : > { %v3166_v62 = vpop.f32.mrf.mxu0 }
 0x196   : > { %v2589_v63 = vpop.f32.mrf.mxu0 }
 0x197   : > { %2764 = vset.pattern.permute.xlu1 %v2942_v0 }
 0x198   : > { %1217 = vperm.xlu1 %2764, %v1086_v60   ;;  %v3169_v1 = vpop.f32.mrf.mxu0 }
 0x19a   : > { %v2599_v2 = vpop.f32.mrf.mxu0 }
 0x19c   : > { %2765 = vset.pattern.permute.xlu1 %v2943_v3  ;;  %v3172_v4 = vpop.f32.mrf.mxu0 }
 0x19d   : > { %1274 = vperm.xlu1 %2765, %v1086_v60   ;;  %v467_v60 = vsel %vm445_vm1, %v444_v59, 0.0 }
 0x19e   : > { %v2609_v5 = vpop.f32.mrf.mxu0 }
 0x1a1   : > { %2766 = vset.pattern.permute.xlu1 %v2940_v57 }
 0x1a4   : > { %v1445_v6 = vpop.f32.mrf.mxu0 }
 0x1a6   : > { %v2625_v7 = vpop.f32.mrf.mxu0 }
 0x20e   : > { %v1161_v8 = vpop.permute.xlu1 %1160  ;;  %v1105_v11 = vpop.permute.xlu0 %1104 }
 0x20f   : > { %v1191_v13 = vmul.f32 %v2470_v9, %v1161_v8  ;;  %v1142_v14 = vmul.f32 %v1105_v11, %v1094_v10  ;;  %v487_v11 = vld [vmem:[%s3094_s17 + $0x8] sm:$0xff] }
 0x211   : > { %v1199_v21 = vadd.f32 %v1191_v13, %v1142_v14 }
 0x213   : > { %v1218_v15 = vpop.permute.xlu1 %1217 }
 0x214   : > { %v1248_v16 = vmul.f32 %v2478_v12, %v1218_v15 }
 0x216   : > { %v1256_v23 = vadd.f32 %v1248_v16, %v1199_v21 }
 0x218   : > { %v1275_v22 = vpop.permute.xlu1 %1274 }
 0x219   : > { %v1305_v25 = vmul.f32 %v2486_v20, %v1275_v22 }
 0x21b   : > { %v1313_v26 = vadd.f32 %v1305_v25, %v1256_v23 }
 0x21d   : > { %v1321_v27 = vrot.slane %v1313_v26, 4 }
 0x21f   : > { %v1322_v28 = vadd.f32 %v1321_v27, %v1313_v26  ;;  %v489_v26 = vld [vmem:[%s3094_s17 + $0x18] sm:$0xff]  ;;  %v491_v27 = vld [vmem:[%s3094_s17 + $0x28] sm:$0xff] }
 0x221   : > { %v1323_v29 = vrot.slane %v1322_v28, 2 }
 0x223   : > { %v1324_v30 = vadd.f32 %v1323_v29, %v1322_v28 }
 0x225   : > { %v1325_v31 = vrot.slane %v1324_v30, 1 }
 0x227   : > { %v1326_v33 = vadd.f32 %v1325_v31, %v1324_v30 }
 0x229   : > { %v1374_v34 = vadd.f32 %v3190_v32, %v1326_v33  ;;  %v493_v33 = vld [vmem:[%s3094_s17 + $0x38] sm:$0xff] }
 0x22b   : > { %v1449_v35 = vadd.f32 %v1445_v6, %v1374_v34  ;;  %v432_v6 = vld [vmem:[%s3069_s16 + $0x18] sm:$0xff]  ;;  %s2880_s16 = sshll.u32 %s2947_s29, 4  ;;  %s2881_s16 = int_to_ptr.vmem [resolvable:$false] %s2880_s16 }
 0x22c   : > { %v440_v7 = vadd.f32 %v432_v6, %v3078_v24 }
 0x22d   : > { %2801 = vtanh.f32 %v1449_v35  ;;  %v2494_v37 = vmul.f32 -1.442695, %v1449_v35 }
 0x22e   : > { %v455_v8 = vsel %vm445_vm1, %v440_v7, 0.0 }
 0x22f   : > { %2803 = vpow2.f32 %v2494_v37 }
 0x23a   : > { %v2802_v36 = vpop.eup %2801 }
 0x23b   : > { %1459 = vrot.lane.b32.xlu1 %v2802_v36, %s2944_s8 }
 0x23c   : > { %v2804_v38 = vpop.eup %2803 }
 0x23d   : > { %v1453_v39 = vadd.f32 1.0, %v2804_v38 }
 0x23f   : > { %2805 = vrcp.f32 %v1453_v39 }
 0x24c   : > { %v2806_v40 = vpop.eup %2805 }
 0x24d   : > { %v1457_v61 = vmul.f32 0.0, %v2806_v40 }
 0x2ad   : > { %v1460_v41 = vpop.permute.xlu1 %1459 }
 0x2ae   : > { %v1462_v42 = vmul.f32 %v2806_v40, %v1460_v41  ;;  %v2471_v41 = vld [vmem:[%s3554_s2 + $0x48] sm:$0xff] }
 0x2b0   : > { %1464 = vrot.lane.b32.xlu1 %v1462_v42, %s2945_s9  ;;  %v1095_v42 = vld [vmem:[%s3554_s2 + $0x8] sm:$0xff] }
 0x2d4   : > { %450 = vadd.xlane.f32.xlu1 %v449_v46 }
 0x2d8   : > { %462 = vadd.xlane.f32.xlu1 %v461_v52 }
 0x2dc   : > { %468 = vadd.xlane.f32.xlu1 %v467_v60 }
 0x322   : > { %v1465_v63 = vpop.permute.xlu1 %1464 }
 0x323   : > { %v3204_v2 = vadd.f32 %v1465_v63, %v1457_v61 }
 0x325   : > { %2807 = vtanh.f32 %v3204_v2 }
 0x332   : > { %v2808_v5 = vpop.eup %2807 }
 0x333   : > { %1470 = vrot.lane.b32.xlu0 %v2808_v5, %s2944_s8  ;;  %v2487_v5 = vld [vmem:[%s3554_s2 + $0xc8] sm:$0xff] }
 0x352   : > { %456 = vadd.xlane.f32.xlu0 %v455_v8 }
 0x35d   : > { %v451_v9 = vpop.xlane.xlu1 %450 }
 0x35e   : > { %v471_v10 = vmax.f32 %v451_v9, 1e-12 }
 0x360   : > { %2809 = vrsqrt.f32 %v471_v10 }
 0x361   : > { %v463_v15 = vpop.xlane.xlu1 %462 }
 0x362   : > { %v475_v16 = vmax.f32 %v463_v15, 1e-12 }
 0x364   : > { %2811 = vrsqrt.f32 %v475_v16 }
 0x365   : > { %v469_v20 = vpop.xlane.xlu1 %468 }
 0x366   : > { %v477_v23 = vmax.f32 %v469_v20, 1e-12 }
 0x36d   : > { %v2810_v12 = vpop.eup %2809 }
 0x36e   : > { %v495_v13 = vmul.f32 %v2810_v12, %v487_v11 }
 0x370   : > { %2581 = vmatpush3.msra.mxu1 %v495_v13 }
 0x371   : > { %2583 = vmatmul.mubr.msk.f32.vlgmr.msra.gmra.mxu1 %vm445_vm1, %v438_v45  ;;  %2590 = vmatprep.subr.mxu1 %v2938_v17  ;;  %v3217_v25 = vpop.eup %2811 }
 0x372   : > { %2592 = vmatprep.mubr.msk.f32.mxu1 %vm2939_vm2, %v2938_v17  ;;  %v499_v30 = vmul.f32 %v3217_v25, %v491_v27 }
 0x3a5   : > { %v1471_v24 = vpop.permute.xlu0 %1470 }
 0x3a6   : > { %v1473_v14 = vmul.f32 %v2806_v40, %v1471_v24 }
 0x3a8   : > { %1476 = vrot.lane.b32.xlu1 %v1473_v14, %s2945_s9 }
 0x3db   : > { %v457_v21 = vpop.xlane.xlu0 %456 }
 0x3dc   : > { %v473_v22 = vmax.f32 %v457_v21, 1e-12 }
 0x3de   : > { %2813 = vrsqrt.f32 %v473_v22 }
 0x3df   : > { %2815 = vrsqrt.f32 %v477_v23 }
 0x3eb   : > { %v3221_v28 = vpop.eup %2813 }
 0x3ec   : > { %v497_v29 = vmul.f32 %v3221_v28, %v489_v26  ;;  %v3225_v31 = vpop.eup %2815 }
 0x3ed   : > { %v501_v34 = vmul.f32 %v3225_v31, %v493_v33 }
 0x3ee   : > { %2591 = vmatpush3.msra.mxu1 %v497_v29 }
 0x3ef   : > { %2593 = vmatmul.mubr.msk.f32.vlgmr.msra.gmra.mxu1 %vm445_vm1, %v440_v7  ;;  %2600 = vmatprep.subr.mxu1 %v2938_v17 }
 0x3f0   : > { %2601 = vmatpush3.msra.mxu1 %v499_v30  ;;  %2602 = vmatprep.mubr.msk.f32.mxu1 %vm2939_vm2, %v2938_v17 }
 0x3f1   : > { %2610 = vmatprep.subr.mxu1 %v2938_v17 }
 0x3f3   : > { %2603 = vmatmul.mubr.msk.f32.vlgmr.msra.gmra.mxu1 %vm445_vm1, %v442_v51 }
 0x3f4   : > { %2611 = vmatpush3.msra.mxu1 %v501_v34  ;;  %2612 = vmatprep.mubr.msk.f32.mxu1 %vm2939_vm2, %v2938_v17 }
 0x3f5   : > { %2626 = vmatprep.subr.mxu1 %v2938_v17 }
 0x3f7   : > { %2613 = vmatmul.mubr.msk.f32.vlgmr.msra.gmra.mxu1 %vm445_vm1, %v444_v59 }
 0x3f8   : > { %2627 = vmatpush3.msra.mxu1 %v3125_v53  ;;  %2634 = vmatprep.mubr.msk.f32.mxu1 %vm2939_vm2, %v2938_v17 }
 0x3f9   : > { %2628 = vmatprep.subr.mxu1 %v2938_v17 }
 0x3fa   : > { %2629 = vmatpush3.msra.mxu1 %v3131_v54 }
 0x3fb   : > { %2630 = vmatprep.subr.mxu1 %v2938_v17 }
 0x3fc   : > { %2631 = vmatpush3.msra.mxu1 %v3140_v55 }
 0x3fd   : > { %2632 = vmatprep.subr.mxu1 %v2938_v17 }
 0x3fe   : > { %2633 = vmatpush3.msra.mxu1 %v3147_v56 }
 0x3ff   : > { %2648 = vmatprep.subr.mxu1 %v2938_v17 }
 0x41a   : > { %v1477_v35 = vpop.permute.xlu1 %1476 }
 0x41b   : > { %2635 = vmatmul.mubr.msk.f32.vlgmr.msra.gmra.mxu1 %vm1375_vm3, %v1477_v35 }
 0x41c   : > { %2649 = vmatpush3.msra.mxu1 %v3125_v53  ;;  %2656 = vmatprep.mubr.msk.f32.mxu1 %vm2939_vm2, %v2938_v17 }
 0x41d   : > { %2650 = vmatprep.subr.mxu1 %v2938_v17 }
 0x41e   : > { %2651 = vmatpush3.msra.mxu1 %v3131_v54 }
 0x41f   : > { %2652 = vmatprep.subr.mxu1 %v2938_v17 }
 0x420   : > { %2653 = vmatpush3.msra.mxu1 %v3140_v55 }
 0x421   : > { %2654 = vmatprep.subr.mxu1 %v2938_v17 }
 0x422   : > { %2655 = vmatpush3.msra.mxu1 %v3147_v56 }
 0x423   : > { %2670 = vmatprep.subr.mxu1 %v2938_v17 }
 0x431   : > { %v644_v36 = vpop.f32.mrf.mxu1 }
 0x432   : > { %v1087_v37 = vmul.f32 %v2810_v12, %v644_v36 }
 0x433   : > { %v2584_v38 = vpop.f32.mrf.mxu1 }
 0x434   : > { %1109 = vperm.xlu0 %2762, %v1087_v37   ;;  %1164 = vperm.xlu1 %2766, %v1087_v37  }
 0x438   : > { %2768 = vset.pattern.permute.xlu0 %v2943_v3  ;;  %2767 = vset.pattern.permute.xlu1 %v2942_v0 }
 0x439   : > { %1278 = vperm.xlu0 %2768, %v1087_v37   ;;  %1221 = vperm.xlu1 %2767, %v1087_v37  }
 0x43d   : > { %2769 = vset.pattern.permute.xlu0 %v2941_v58  ;;  %2770 = vset.pattern.permute.xlu1 %v2940_v57 }
 0x4af   : > { %v1165_v39 = vpop.permute.xlu1 %1164  ;;  %v3264_v40 = vpop.f32.mrf.mxu1 }
 0x4b0   : > { %v1110_v43 = vpop.permute.xlu0 %1109  ;;  %v1192_v49 = vmul.f32 %v2471_v41, %v1165_v39  ;;  %v1088_v39 = vmul.f32 %v3101_v47, %v3166_v62  ;;  %v2472_v62 = vld [vmem:[%s3554_s2 + $0x50] sm:$0xff] }
 0x4b1   : > { %v2594_v45 = vpop.f32.mrf.mxu1  ;;  %v1143_v51 = vmul.f32 %v1110_v43, %v1095_v42  ;;  %v1096_v43 = vld [vmem:[%s3554_s2 + $0x10] sm:$0xff] }
 0x4b3   : > { %v3272_v46 = vpop.f32.mrf.mxu1  ;;  %v1200_v63 = vadd.f32 %v1192_v49, %v1143_v51 }
 0x4b4   : > { %v1222_v52 = vpop.permute.xlu1 %1221  ;;  %v1279_v6 = vpop.permute.xlu0 %1278 }
 0x4b5   : > { %v2604_v59 = vpop.f32.mrf.mxu1  ;;  %v1249_v60 = vmul.f32 %v2479_v48, %v1222_v52  ;;  %v1306_v9 = vmul.f32 %v2487_v5, %v1279_v6  ;;  %v2480_v48 = vld [vmem:[%s3554_s2 + $0x90] sm:$0xff] }
 0x4b7   : > { %v3277_v61 = vpop.f32.mrf.mxu1  ;;  %v1257_v8 = vadd.f32 %v1249_v60, %v1200_v63  ;;  %v2488_v63 = vld [vmem:[%s3554_s2 + $0xd0] sm:$0xff] }
 0x4b9   : > { %v2614_v7 = vpop.f32.mrf.mxu1  ;;  %v1314_v10 = vadd.f32 %v1306_v9, %v1257_v8 }
 0x4bb   : > { %v1327_v11 = vrot.slane %v1314_v10, 4 }
 0x4bd   : > { %v1328_v12 = vadd.f32 %v1327_v11, %v1314_v10 }
 0x4bf   : > { %v1329_v13 = vrot.slane %v1328_v12, 2 }
 0x4c1   : > { %v1330_v24 = vadd.f32 %v1329_v13, %v1328_v12 }
 0x4c3   : > { %v1331_v14 = vrot.slane %v1330_v24, 1 }
 0x4c5   : > { %v1332_v15 = vadd.f32 %v1331_v14, %v1330_v24 }
 0x4c7   : > { %v1474_v16 = vadd.f32 %v3190_v32, %v1332_v15 }
 0x4db   : > { %v1546_v20 = vpop.f32.mrf.mxu1 }
 0x4dc   : > { %v1550_v21 = vadd.f32 %v1546_v20, %v1474_v16 }
 0x4dd   : > { %v2636_v22 = vpop.f32.mrf.mxu1 }
 0x4de   : > { %2817 = vtanh.f32 %v1550_v21  ;;  %v2496_v26 = vmul.f32 -1.442695, %v1550_v21 }
 0x4e0   : > { %2819 = vpow2.f32 %v2496_v26 }
 0x4eb   : > { %v2818_v23 = vpop.eup %2817 }
 0x4ec   : > { %1560 = vrot.lane.b32.xlu1 %v2818_v23, %s2944_s8 }
 0x4ed   : > { %v2820_v27 = vpop.eup %2819 }
 0x4ee   : > { %v1554_v29 = vadd.f32 1.0, %v2820_v27 }
 0x4f0   : > { %2821 = vrcp.f32 %v1554_v29 }
 0x4fd   : > { %v2822_v30 = vpop.eup %2821 }
 0x4fe   : > { %v1558_v35 = vmul.f32 %v2822_v30, %v3204_v2 }
 0x55e   : > { %v1561_v33 = vpop.permute.xlu1 %1560 }
 0x55f   : > { %v1563_v34 = vmul.f32 %v2822_v30, %v1561_v33 }
 0x561   : > { %1565 = vrot.lane.b32.xlu1 %v1563_v34, %s2945_s9 }
 0x5d3   : > { %v1566_v36 = vpop.permute.xlu1 %1565 }
 0x5d4   : > { %v3286_v37 = vadd.f32 %v1566_v36, %v1558_v35 }
 0x5d6   : > { %2823 = vtanh.f32 %v3286_v37 }
 0x5e3   : > { %v2824_v38 = vpop.eup %2823 }
 0x5e4   : > { %1571 = vrot.lane.b32.xlu0 %v2824_v38, %s2944_s8  ;;  %v1089_v38 = vmul.f32 %v3221_v28, %v3264_v40  ;;  %v2473_v40 = vld [vmem:[%s3554_s2 + $0x58] sm:$0xff] }
 0x5e8   : > { %1114 = vperm.xlu0 %2769, %v1088_v39  }
 0x5ec   : > { %2772 = vset.pattern.permute.xlu0 %v2943_v3 }
 0x5ed   : > { %1282 = vperm.xlu0 %2772, %v1088_v39  }
 0x5f1   : > { %2773 = vset.pattern.permute.xlu0 %v2941_v58 }
 0x656   : > { %v1572_v41 = vpop.permute.xlu0 %1571 }
 0x657   : > { %v1574_v42 = vmul.f32 %v2822_v30, %v1572_v41 }
 0x659   : > { %1577 = vrot.lane.b32.xlu1 %v1574_v42, %s2945_s9  ;;  %v1097_v42 = vld [vmem:[%s3554_s2 + $0x18] sm:$0xff] }
 0x65d   : > { %1168 = vperm.xlu1 %2770, %v1088_v39  }
 0x661   : > { %2771 = vset.pattern.permute.xlu1 %v2942_v0 }
 0x662   : > { %1225 = vperm.xlu1 %2771, %v1088_v39  }
 0x663   : > { %v1115_v45 = vpop.permute.xlu0 %1114 }
 0x664   : > { %v1144_v52 = vmul.f32 %v1115_v45, %v1096_v43 }
 0x666   : > { %2774 = vset.pattern.permute.xlu1 %v2940_v57 }
 0x668   : > { %v1283_v5 = vpop.permute.xlu0 %1282 }
 0x669   : > { %v1307_v7 = vmul.f32 %v2488_v63, %v1283_v5 }
 0x6cb   : > { %v1578_v2 = vpop.permute.xlu1 %1577 }
 0x6cc   : > { %2646 = vmatmul.mubr.msk.f32.vlgmr.msra.gmra.mxu0 %vm1375_vm3, %v1578_v2 }
 0x6cd   : > { %2660 = vmatpush3.msra.mxu0 %v3125_v53  ;;  %2667 = vmatprep.mubr.msk.f32.mxu0 %vm2939_vm2, %v2938_v17 }
 0x6ce   : > { %2661 = vmatprep.subr.mxu0 %v2938_v17 }
 0x6cf   : > { %2662 = vmatpush3.msra.mxu0 %v3131_v54 }
 0x6d0   : > { %2663 = vmatprep.subr.mxu0 %v2938_v17 }
 0x6d1   : > { %2664 = vmatpush3.msra.mxu0 %v3140_v55 }
 0x6d2   : > { %2665 = vmatprep.subr.mxu0 %v2938_v17 }
 0x6d3   : > { %2666 = vmatpush3.msra.mxu0 %v3147_v56 }
 0x6d4   : > { %2681 = vmatprep.subr.mxu0 %v2938_v17 }
 0x6d8   : > { %v1169_v47 = vpop.permute.xlu1 %1168 }
 0x6d9   : > { %v1193_v51 = vmul.f32 %v2472_v62, %v1169_v47  ;;  %v2481_v47 = vld [vmem:[%s3554_s2 + $0x98] sm:$0xff] }
 0x6db   : > { %v1201_v60 = vadd.f32 %v1193_v51, %v1144_v52  ;;  %v2489_v51 = vld [vmem:[%s3554_s2 + $0xd8] sm:$0xff] }
 0x6dd   : > { %v1226_v49 = vpop.permute.xlu1 %1225 }
 0x6de   : > { %v1250_v59 = vmul.f32 %v2480_v48, %v1226_v49 }
 0x6e0   : > { %v1258_v6 = vadd.f32 %v1250_v59, %v1201_v60 }
 0x6e2   : > { %v1315_v8 = vadd.f32 %v1307_v7, %v1258_v6 }
 0x6e4   : > { %v1333_v9 = vrot.slane %v1315_v8, 4 }
 0x6e6   : > { %v1334_v10 = vadd.f32 %v1333_v9, %v1315_v8 }
 0x6e8   : > { %v1335_v11 = vrot.slane %v1334_v10, 2 }
 0x6ea   : > { %v1336_v12 = vadd.f32 %v1335_v11, %v1334_v10 }
 0x6ec   : > { %v1337_v13 = vrot.slane %v1336_v12, 1 }
 0x6ee   : > { %v1338_v24 = vadd.f32 %v1337_v13, %v1336_v12 }
 0x6f0   : > { %v1575_v14 = vadd.f32 %v3190_v32, %v1338_v24 }
 0x78c   : > { %v1647_v15 = vpop.f32.mrf.mxu0 }
 0x78d   : > { %v1651_v16 = vadd.f32 %v1647_v15, %v1575_v14 }
 0x78e   : > { %v2647_v20 = vpop.f32.mrf.mxu0 }
 0x78f   : > { %2825 = vtanh.f32 %v1651_v16  ;;  %v2498_v22 = vmul.f32 -1.442695, %v1651_v16 }
 0x791   : > { %2827 = vpow2.f32 %v2498_v22 }
 0x79c   : > { %v2826_v21 = vpop.eup %2825 }
 0x79d   : > { %1661 = vrot.lane.b32.xlu1 %v2826_v21, %s2944_s8 }
 0x79e   : > { %v2828_v23 = vpop.eup %2827 }
 0x79f   : > { %v1655_v26 = vadd.f32 1.0, %v2828_v23 }
 0x7a1   : > { %2829 = vrcp.f32 %v1655_v26 }
 0x7ae   : > { %v2830_v27 = vpop.eup %2829 }
 0x7af   : > { %v1659_v33 = vmul.f32 %v2830_v27, %v3286_v37 }
 0x80f   : > { %v1662_v29 = vpop.permute.xlu1 %1661 }
 0x810   : > { %v1664_v30 = vmul.f32 %v2830_v27, %v1662_v29 }
 0x812   : > { %1666 = vrot.lane.b32.xlu1 %v1664_v30, %s2945_s9 }
 0x884   : > { %v1667_v34 = vpop.permute.xlu1 %1666 }
 0x885   : > { %v3324_v35 = vadd.f32 %v1667_v34, %v1659_v33  ;;  %v1090_v33 = vmul.f32 %v3097_v44, %v3169_v1  ;;  %v2474_v1 = vld [vmem:[%s3554_s2 + $0x60] sm:$0xff] }
 0x887   : > { %2831 = vtanh.f32 %v3324_v35 }
 0x894   : > { %v2832_v36 = vpop.eup %2831 }
 0x895   : > { %1672 = vrot.lane.b32.xlu0 %v2832_v36, %s2944_s8 }
 0x899   : > { %1119 = vperm.xlu0 %2773, %v1089_v38  }
 0x89d   : > { %2776 = vset.pattern.permute.xlu0 %v2943_v3 }
 0x89e   : > { %1286 = vperm.xlu0 %2776, %v1089_v38  }
 0x8a2   : > { %2777 = vset.pattern.permute.xlu0 %v2941_v58 }
 0x907   : > { %v1673_v39 = vpop.permute.xlu0 %1672 }
 0x908   : > { %v1675_v41 = vmul.f32 %v2830_v27, %v1673_v39 }
 0x90a   : > { %1678 = vrot.lane.b32.xlu1 %v1675_v41, %s2945_s9  ;;  %v2482_v41 = vld [vmem:[%s3554_s2 + $0xa0] sm:$0xff] }
 0x90e   : > { %1172 = vperm.xlu1 %2774, %v1089_v38  }
 0x912   : > { %2775 = vset.pattern.permute.xlu1 %v2942_v0 }
 0x913   : > { %1229 = vperm.xlu1 %2775, %v1089_v38   ;;  %v1098_v38 = vld [vmem:[%s3554_s2 + $0x20] sm:$0xff] }
 0x914   : > { %v1120_v2 = vpop.permute.xlu0 %1119 }
 0x915   : > { %v1145_v45 = vmul.f32 %v1120_v2, %v1097_v42 }
 0x917   : > { %2778 = vset.pattern.permute.xlu1 %v2940_v57 }
 0x919   : > { %v1287_v52 = vpop.permute.xlu0 %1286 }
 0x91a   : > { %v1308_v60 = vmul.f32 %v2489_v51, %v1287_v52 }
 0x97c   : > { %v1679_v37 = vpop.permute.xlu1 %1678 }
 0x97d   : > { %2657 = vmatmul.mubr.msk.f32.vlgmr.msra.gmra.mxu1 %vm1375_vm3, %v1679_v37 }
 0x97e   : > { %2671 = vmatpush3.msra.mxu1 %v3125_v53  ;;  %2678 = vmatprep.mubr.msk.f32.mxu1 %vm2939_vm2, %v2938_v17 }
 0x97f   : > { %2672 = vmatprep.subr.mxu1 %v2938_v17 }
 0x980   : > { %2673 = vmatpush3.msra.mxu1 %v3131_v54 }
 0x981   : > { %2674 = vmatprep.subr.mxu1 %v2938_v17 }
 0x982   : > { %2675 = vmatpush3.msra.mxu1 %v3140_v55 }
 0x983   : > { %2676 = vmatprep.subr.mxu1 %v2938_v17 }
 0x984   : > { %2677 = vmatpush3.msra.mxu1 %v3147_v56 }
 0x985   : > { %2692 = vmatprep.subr.mxu1 %v2938_v17 }
 0x989   : > { %v1173_v28 = vpop.permute.xlu1 %1172 }
 0x98a   : > { %v1194_v43 = vmul.f32 %v2473_v40, %v1173_v28 }
 0x98c   : > { %v1202_v49 = vadd.f32 %v1194_v43, %v1145_v45 }
 0x98e   : > { %v1230_v62 = vpop.permute.xlu1 %1229 }
 0x98f   : > { %v1251_v48 = vmul.f32 %v2481_v47, %v1230_v62  ;;  %v2490_v47 = vld [vmem:[%s3554_s2 + $0xe0] sm:$0xff] }
 0x991   : > { %v1259_v59 = vadd.f32 %v1251_v48, %v1202_v49 }
 0x993   : > { %v1316_v63 = vadd.f32 %v1308_v60, %v1259_v59 }
 0x995   : > { %v1339_v5 = vrot.slane %v1316_v63, 4 }
 0x997   : > { %v1340_v6 = vadd.f32 %v1339_v5, %v1316_v63 }
 0x999   : > { %v1341_v7 = vrot.slane %v1340_v6, 2 }
 0x99b   : > { %v1342_v8 = vadd.f32 %v1341_v7, %v1340_v6 }
 0x99d   : > { %v1343_v9 = vrot.slane %v1342_v8, 1 }
 0x99f   : > { %v1344_v10 = vadd.f32 %v1343_v9, %v1342_v8 }
 0x9a1   : > { %v1676_v11 = vadd.f32 %v3190_v32, %v1344_v10 }
 0xa3d   : > { %v1748_v12 = vpop.f32.mrf.mxu1 }
 0xa3e   : > { %v1752_v13 = vadd.f32 %v1748_v12, %v1676_v11 }
 0xa3f   : > { %v2658_v24 = vpop.f32.mrf.mxu1 }
 0xa40   : > { %2833 = vtanh.f32 %v1752_v13  ;;  %v2500_v15 = vmul.f32 -1.442695, %v1752_v13 }
 0xa42   : > { %2835 = vpow2.f32 %v2500_v15 }
 0xa4d   : > { %v2834_v14 = vpop.eup %2833 }
 0xa4e   : > { %1762 = vrot.lane.b32.xlu1 %v2834_v14, %s2944_s8 }
 0xa4f   : > { %v2836_v16 = vpop.eup %2835 }
 0xa50   : > { %v1756_v20 = vadd.f32 1.0, %v2836_v16 }
 0xa52   : > { %2837 = vrcp.f32 %v1756_v20 }
 0xa5f   : > { %v2838_v21 = vpop.eup %2837 }
 0xa60   : > { %v1760_v26 = vmul.f32 %v2838_v21, %v3324_v35 }
 0xac0   : > { %v1763_v22 = vpop.permute.xlu1 %1762 }
 0xac1   : > { %v1765_v23 = vmul.f32 %v2838_v21, %v1763_v22  ;;  %v1091_v22 = vmul.f32 %v3217_v25, %v3272_v46  ;;  %v1099_v46 = vld [vmem:[%s3554_s2 + $0x28] sm:$0xff] }
 0xac3   : > { %1767 = vrot.lane.b32.xlu1 %v1765_v23, %s2945_s9 }
 0xb35   : > { %v1768_v27 = vpop.permute.xlu1 %1767 }
 0xb36   : > { %v3362_v29 = vadd.f32 %v1768_v27, %v1760_v26 }
 0xb38   : > { %2839 = vtanh.f32 %v3362_v29 }
 0xb45   : > { %v2840_v30 = vpop.eup %2839 }
 0xb46   : > { %1773 = vrot.lane.b32.xlu0 %v2840_v30, %s2944_s8 }
 0xb4a   : > { %1124 = vperm.xlu0 %2777, %v1090_v33  }
 0xb4e   : > { %2780 = vset.pattern.permute.xlu0 %v2943_v3 }
 0xb4f   : > { %1290 = vperm.xlu0 %2780, %v1090_v33  }
 0xb53   : > { %2781 = vset.pattern.permute.xlu0 %v2941_v58 }
 0xbb8   : > { %v1774_v34 = vpop.permute.xlu0 %1773 }
 0xbb9   : > { %v1776_v36 = vmul.f32 %v2838_v21, %v1774_v34 }
 0xbbb   : > { %1779 = vrot.lane.b32.xlu1 %v1776_v36, %s2945_s9 }
 0xbbf   : > { %1176 = vperm.xlu1 %2778, %v1090_v33  }
 0xbc3   : > { %2779 = vset.pattern.permute.xlu1 %v2942_v0 }
 0xbc4   : > { %1233 = vperm.xlu1 %2779, %v1090_v33  }
 0xbc5   : > { %v1125_v39 = vpop.permute.xlu0 %1124 }
 0xbc6   : > { %v1146_v40 = vmul.f32 %v1125_v39, %v1098_v38 }
 0xbc8   : > { %2782 = vset.pattern.permute.xlu1 %v2940_v57 }
 0xbca   : > { %v1291_v62 = vpop.permute.xlu0 %1290 }
 0xbcb   : > { %v1309_v45 = vmul.f32 %v2490_v47, %v1291_v62 }
 0xc2d   : > { %v1780_v35 = vpop.permute.xlu1 %1779 }
 0xc2e   : > { %2668 = vmatmul.mubr.msk.f32.vlgmr.msra.gmra.mxu0 %vm1375_vm3, %v1780_v35 }
 0xc2f   : > { %2682 = vmatpush3.msra.mxu0 %v3125_v53  ;;  %2689 = vmatprep.mubr.msk.f32.mxu0 %vm2939_vm2, %v2938_v17 }
 0xc30   : > { %2683 = vmatprep.subr.mxu0 %v2938_v17 }
 0xc31   : > { %2684 = vmatpush3.msra.mxu0 %v3131_v54 }
 0xc32   : > { %2685 = vmatprep.subr.mxu0 %v2938_v17 }
 0xc33   : > { %2686 = vmatpush3.msra.mxu0 %v3140_v55 }
 0xc34   : > { %2687 = vmatprep.subr.mxu0 %v2938_v17 }
 0xc35   : > { %2688 = vmatpush3.msra.mxu0 %v3147_v56 }
 0xc36   : > { %2703 = vmatprep.subr.mxu0 %v2938_v17 }
 0xc3a   : > { %v1177_v44 = vpop.permute.xlu1 %1176 }
 0xc3b   : > { %v1195_v28 = vmul.f32 %v2474_v1, %v1177_v44 }
 0xc3d   : > { %v1203_v2 = vadd.f32 %v1195_v28, %v1146_v40 }
 0xc3f   : > { %v1234_v37 = vpop.permute.xlu1 %1233 }
 0xc40   : > { %v1252_v42 = vmul.f32 %v2482_v41, %v1234_v37 }
 0xc42   : > { %v1260_v43 = vadd.f32 %v1252_v42, %v1203_v2 }
 0xc44   : > { %v1317_v48 = vadd.f32 %v1309_v45, %v1260_v43 }
 0xc46   : > { %v1345_v49 = vrot.slane %v1317_v48, 4 }
 0xc48   : > { %v1346_v51 = vadd.f32 %v1345_v49, %v1317_v48 }
 0xc4a   : > { %v1347_v52 = vrot.slane %v1346_v51, 2 }
 0xc4c   : > { %v1348_v59 = vadd.f32 %v1347_v52, %v1346_v51 }
 0xc4e   : > { %v1349_v60 = vrot.slane %v1348_v59, 1 }
 0xc50   : > { %v1350_v63 = vadd.f32 %v1349_v60, %v1348_v59 }
 0xc52   : > { %v1777_v5 = vadd.f32 %v3190_v32, %v1350_v63 }
 0xcee   : > { %v1849_v6 = vpop.f32.mrf.mxu0 }
 0xcef   : > { %v1853_v7 = vadd.f32 %v1849_v6, %v1777_v5 }
 0xcf0   : > { %v2669_v8 = vpop.f32.mrf.mxu0 }
 0xcf1   : > { %2841 = vtanh.f32 %v1853_v7  ;;  %v2502_v10 = vmul.f32 -1.442695, %v1853_v7  ;;  %v1092_v8 = vmul.f32 %v3109_v50, %v3172_v4  ;;  %v1100_v4 = vld [vmem:[%s3554_s2 + $0x30] sm:$0xff] }
 0xcf3   : > { %2843 = vpow2.f32 %v2502_v10 }
 0xcfe   : > { %v2842_v9 = vpop.eup %2841 }
 0xcff   : > { %1863 = vrot.lane.b32.xlu1 %v2842_v9, %s2944_s8 }
 0xd00   : > { %v2844_v11 = vpop.eup %2843 }
 0xd01   : > { %v1857_v12 = vadd.f32 1.0, %v2844_v11 }
 0xd03   : > { %2845 = vrcp.f32 %v1857_v12 }
 0xd10   : > { %v2846_v13 = vpop.eup %2845 }
 0xd11   : > { %v1861_v15 = vmul.f32 %v2846_v13, %v3362_v29 }
 0xd71   : > { %v1864_v24 = vpop.permute.xlu1 %1863 }
 0xd72   : > { %v1866_v14 = vmul.f32 %v2846_v13, %v1864_v24 }
 0xd74   : > { %1868 = vrot.lane.b32.xlu1 %v1866_v14, %s2945_s9 }
 0xde6   : > { %v1869_v16 = vpop.permute.xlu1 %1868 }
 0xde7   : > { %v3400_v20 = vadd.f32 %v1869_v16, %v1861_v15 }
 0xde9   : > { %2847 = vtanh.f32 %v3400_v20 }
 0xdf6   : > { %v2848_v21 = vpop.eup %2847 }
 0xdf7   : > { %1874 = vrot.lane.b32.xlu0 %v2848_v21, %s2944_s8 }
 0xdfb   : > { %1129 = vperm.xlu0 %2781, %v1091_v22  }
 0xdff   : > { %2784 = vset.pattern.permute.xlu0 %v2943_v3 }
 0xe00   : > { %1294 = vperm.xlu0 %2784, %v1091_v22  }
 0xe04   : > { %2785 = vset.pattern.permute.xlu0 %v2941_v58 }
 0xe69   : > { %v1875_v23 = vpop.permute.xlu0 %1874 }
 0xe6a   : > { %v1877_v26 = vmul.f32 %v2846_v13, %v1875_v23 }
 0xe6c   : > { %1880 = vrot.lane.b32.xlu1 %v1877_v26, %s2945_s9 }
 0xe70   : > { %1180 = vperm.xlu1 %2782, %v1091_v22  }
 0xe74   : > { %2783 = vset.pattern.permute.xlu1 %v2942_v0 }
 0xe75   : > { %1237 = vperm.xlu1 %2783, %v1091_v22  }
 0xe76   : > { %v1130_v29 = vpop.permute.xlu0 %1129 }
 0xe77   : > { %v1147_v33 = vmul.f32 %v1130_v29, %v1099_v46 }
 0xe79   : > { %2786 = vset.pattern.permute.xlu1 %v2940_v57 }
 0xe7b   : > { %v1295_v35 = vpop.permute.xlu0 %1294 }
 0xede   : > { %v1881_v27 = vpop.permute.xlu1 %1880 }
 0xedf   : > { %2679 = vmatmul.mubr.msk.f32.vlgmr.msra.gmra.mxu1 %vm1375_vm3, %v1881_v27 }
 0xee0   : > { %2693 = vmatpush3.msra.mxu1 %v3125_v53  ;;  %2700 = vmatprep.mubr.msk.f32.mxu1 %vm2939_vm2, %v2938_v17  ;;  %v2475_v53 = vld [vmem:[%s3554_s2 + $0x68] sm:$0xff] }
 0xee1   : > { %2694 = vmatprep.subr.mxu1 %v2938_v17 }
 0xee2   : > { %2695 = vmatpush3.msra.mxu1 %v3131_v54  ;;  %v2483_v54 = vld [vmem:[%s3554_s2 + $0xa8] sm:$0xff] }
 0xee3   : > { %2696 = vmatprep.subr.mxu1 %v2938_v17 }
 0xee4   : > { %2697 = vmatpush3.msra.mxu1 %v3140_v55 }
 0xee5   : > { %2698 = vmatprep.subr.mxu1 %v2938_v17 }
 0xee6   : > { %2699 = vmatpush3.msra.mxu1 %v3147_v56  ;;  %v2491_v56 = vld [vmem:[%s3554_s2 + $0xe8] sm:$0xff] }
 0xee7   : > { %v1310_v1 = vmul.f32 %v2491_v56, %v1295_v35 }
 0xeeb   : > { %v1181_v25 = vpop.permute.xlu1 %1180 }
 0xeec   : > { %v1196_v55 = vmul.f32 %v2475_v53, %v1181_v25 }
 0xeee   : > { %v1204_v36 = vadd.f32 %v1196_v55, %v1147_v33 }
 0xef0   : > { %v1238_v30 = vpop.permute.xlu1 %1237 }
 0xef1   : > { %v1253_v34 = vmul.f32 %v2483_v54, %v1238_v30 }
 0xef3   : > { %v1261_v44 = vadd.f32 %v1253_v34, %v1204_v36 }
 0xef5   : > { %v1318_v38 = vadd.f32 %v1310_v1, %v1261_v44 }
 0xef7   : > { %v1351_v39 = vrot.slane %v1318_v38, 4 }
 0xef9   : > { %v1352_v41 = vadd.f32 %v1351_v39, %v1318_v38 }
 0xefb   : > { %v1353_v37 = vrot.slane %v1352_v41, 2 }
 0xefd   : > { %v1354_v28 = vadd.f32 %v1353_v37, %v1352_v41 }
 0xeff   : > { %v1355_v40 = vrot.slane %v1354_v28, 1 }
 0xf01   : > { %v1356_v42 = vadd.f32 %v1355_v40, %v1354_v28  ;;  %v1093_v40 = vmul.f32 %v3225_v31, %v3277_v61  ;;  %v2477_v31 = vld [vmem:[%s3554_s2 + $0x78] sm:$0xff] }
 0xf03   : > { %v1878_v2 = vadd.f32 %v3190_v32, %v1356_v42 }
 0xf9f   : > { %v1950_v47 = vpop.f32.mrf.mxu1 }
 0xfa0   : > { %v1954_v62 = vadd.f32 %v1950_v47, %v1878_v2 }
 0xfa1   : > { %v2680_v43 = vpop.f32.mrf.mxu1 }
 0xfa2   : > { %2849 = vtanh.f32 %v1954_v62  ;;  %v2504_v48 = vmul.f32 -1.442695, %v1954_v62  ;;  %v2485_v43 = vld [vmem:[%s3554_s2 + $0xb8] sm:$0xff] }
 0xfa4   : > { %2851 = vpow2.f32 %v2504_v48 }
 0xfaf   : > { %v2850_v45 = vpop.eup %2849 }
 0xfb0   : > { %1964 = vrot.lane.b32.xlu1 %v2850_v45, %s2944_s8 }
 0xfb1   : > { %v2852_v49 = vpop.eup %2851 }
 0xfb2   : > { %v1958_v51 = vadd.f32 1.0, %v2852_v49 }
 0xfb4   : > { %2853 = vrcp.f32 %v1958_v51 }
 0xfc1   : > { %v2854_v52 = vpop.eup %2853 }
 0xfc2   : > { %v1962_v63 = vmul.f32 %v2854_v52, %v3400_v20  ;;  %v2492_v20 = vld [vmem:[%s3554_s2 + $0xf0] sm:$0xff] }
0x1022   : > { %v1965_v59 = vpop.permute.xlu1 %1964 }
0x1023   : > { %v1967_v60 = vmul.f32 %v2854_v52, %v1965_v59 }
0x1025   : > { %1969 = vrot.lane.b32.xlu1 %v1967_v60, %s2945_s9 }
0x1097   : > { %v1970_v5 = vpop.permute.xlu1 %1969 }
0x1098   : > { %v1972_v6 = vadd.f32 %v1970_v5, %v1962_v63 }
0x109a   : > { %2855 = vtanh.f32 %v1972_v6 }
0x10a7   : > { %v2856_v7 = vpop.eup %2855 }
0x10a8   : > { %1975 = vrot.lane.b32.xlu0 %v2856_v7, %s2944_s8 }
0x10ac   : > { %1134 = vperm.xlu0 %2785, %v1092_v8  }
0x10b0   : > { %2788 = vset.pattern.permute.xlu0 %v2943_v3 }
0x10b1   : > { %1298 = vperm.xlu0 %2788, %v1092_v8  }
0x10b5   : > { %2789 = vset.pattern.permute.xlu0 %v2941_v58  ;;  %v2476_v58 = vld [vmem:[%s3554_s2 + $0x70] sm:$0xff] }
0x111a   : > { %v1976_v9 = vpop.permute.xlu0 %1975 }
0x111b   : > { %v1978_v10 = vmul.f32 %v2854_v52, %v1976_v9  ;;  %v2493_v52 = vld [vmem:[%s3554_s2 + $0xf8] sm:$0xff] }
0x111d   : > { %1981 = vrot.lane.b32.xlu1 %v1978_v10, %s2945_s9 }
0x1121   : > { %1184 = vperm.xlu1 %2786, %v1092_v8  }
0x1125   : > { %2787 = vset.pattern.permute.xlu1 %v2942_v0 }
0x1126   : > { %1241 = vperm.xlu1 %2787, %v1092_v8  }
0x1127   : > { %v1135_v12 = vpop.permute.xlu0 %1134 }
0x1128   : > { %v1148_v14 = vmul.f32 %v1135_v12, %v1100_v4 }
0x112a   : > { %2790 = vset.pattern.permute.xlu1 %v2940_v57  ;;  %v2484_v57 = vld [vmem:[%s3554_s2 + $0xb0] sm:$0xff] }
0x112c   : > { %v1299_v21 = vpop.permute.xlu0 %1298 }
0x112d   : > { %v1311_v23 = vmul.f32 %v2492_v20, %v1299_v21 }
0x118f   : > { %v1982_v11 = vpop.permute.xlu1 %1981 }
0x1190   : > { %2690 = vmatmul.mubr.msk.f32.vlgmr.msra.gmra.mxu0 %vm1375_vm3, %v1982_v11 }
0x1191   : > { %2711 = vmatprep.mubr.msk.f32.mxu0 %vm2939_vm2, %v2938_v17 }
0x119c   : > { %v1185_v50 = vpop.permute.xlu1 %1184 }
0x119d   : > { %v1197_v24 = vmul.f32 %v2476_v58, %v1185_v50  ;;  %v2875_v50 = vld [vmem:[%s3556_s4] sm:$0x1] }
0x119f   : > { %v1205_v16 = vadd.f32 %v1197_v24, %v1148_v14 }
0x11a1   : > { %v1242_v13 = vpop.permute.xlu1 %1241 }
0x11a2   : > { %v1254_v15 = vmul.f32 %v2484_v57, %v1242_v13 }
0x11a4   : > { %v1262_v22 = vadd.f32 %v1254_v15, %v1205_v16 }
0x11a6   : > { %v1319_v26 = vadd.f32 %v1311_v23, %v1262_v22 }
0x11a8   : > { %v1357_v27 = vrot.slane %v1319_v26, 4 }
0x11aa   : > { %v1358_v25 = vadd.f32 %v1357_v27, %v1319_v26  ;;  %v2184_v27 = vld [vmem:[%s3557_s5 + $0x18] sm:$0xff] }
0x11ab   : > { %2704 = vmatpush3.msra.mxu0 %v2184_v27 }
0x11ac   : > { %v1359_v53 = vrot.slane %v1358_v25, 2  ;;  %2705 = vmatprep.subr.mxu0 %v2938_v17 }
0x11ae   : > { %v1360_v46 = vadd.f32 %v1359_v53, %v1358_v25  ;;  %v2183_v25 = vld [vmem:[%s3557_s5 + $0x10] sm:$0xff]  ;;  %v2182_v53 = vld [vmem:[%s3557_s5 + $0x8] sm:$0xff] }
0x11af   : > { %2706 = vmatpush3.msra.mxu0 %v2183_v25 }
0x11b0   : > { %v1361_v29 = vrot.slane %v1360_v46, 1  ;;  %2707 = vmatprep.subr.mxu0 %v2938_v17 }
0x11b1   : > { %2708 = vmatpush3.msra.mxu0 %v2182_v53 }
0x11b2   : > { %v1362_v54 = vadd.f32 %v1361_v29, %v1360_v46  ;;  %v2181_v46 = vld [vmem:[%s3557_s5] sm:$0xff]  ;;  %2709 = vmatprep.subr.mxu0 %v2938_v17 }
0x11b3   : > { %2710 = vmatpush3.msra.mxu0 %v2181_v46 }
0x11b4   : > { %v1979_v30 = vadd.f32 %v3190_v32, %v1362_v54 }
0x1250   : > { %v2051_v55 = vpop.f32.mrf.mxu0 }
0x1251   : > { %v2055_v33 = vadd.f32 %v2051_v55, %v1979_v30 }
0x1252   : > { %v2691_v34 = vpop.f32.mrf.mxu0 }
0x1253   : > { %2857 = vtanh.f32 %v2055_v33  ;;  %v2506_v56 = vmul.f32 -1.442695, %v2055_v33  ;;  %v2185_v33 = vld [vmem:[%s3558_s6] sm:$0x1]  ;;  %v2263_v34 = vsub.s32 0, %v3063_v18 }
0x1255   : > { %2859 = vpow2.f32 %v2506_v56 }
0x1260   : > { %v2858_v36 = vpop.eup %2857 }
0x1261   : > { %2065 = vrot.lane.b32.xlu1 %v2858_v36, %s2944_s8 }
0x1262   : > { %v2860_v35 = vpop.eup %2859 }
0x1263   : > { %v2059_v44 = vadd.f32 1.0, %v2860_v35 }
0x1265   : > { %2861 = vrcp.f32 %v2059_v44 }
0x1272   : > { %v2862_v1 = vpop.eup %2861 }
0x1273   : > { %v2063_v41 = vmul.f32 %v2862_v1, %v1972_v6 }
0x12d3   : > { %v2066_v38 = vpop.permute.xlu1 %2065 }
0x12d4   : > { %v2068_v39 = vmul.f32 %v2862_v1, %v2066_v38 }
0x12d6   : > { %2070 = vrot.lane.b32.xlu1 %v2068_v39, %s2945_s9 }
0x1348   : > { %v2071_v37 = vpop.permute.xlu1 %2070 }
0x1349   : > { %v2073_v32 = vadd.f32 %v2071_v37, %v2063_v41 }
0x134b   : > { %2863 = vtanh.f32 %v2073_v32 }
0x1358   : > { %v2864_v28 = vpop.eup %2863 }
0x1359   : > { %2076 = vrot.lane.b32.xlu0 %v2864_v28, %s2944_s8 }
0x135d   : > { %1139 = vperm.xlu0 %2789, %v1093_v40  }
0x1361   : > { %2792 = vset.pattern.permute.xlu0 %v2943_v3  ;;  %v1101_v3 = vld [vmem:[%s3554_s2 + $0x38] sm:$0xff] }
0x1362   : > { %1302 = vperm.xlu0 %2792, %v1093_v40  }
0x13cb   : > { %v2077_v42 = vpop.permute.xlu0 %2076 }
0x13cc   : > { %v2079_v2 = vmul.f32 %v2862_v1, %v2077_v42 }
0x13ce   : > { %2082 = vrot.lane.b32.xlu1 %v2079_v2, %s2945_s9 }
0x13d2   : > { %1188 = vperm.xlu1 %2790, %v1093_v40  }
0x13d6   : > { %2791 = vset.pattern.permute.xlu1 %v2942_v0 }
0x13d7   : > { %1245 = vperm.xlu1 %2791, %v1093_v40  }
0x13d8   : > { %v1140_v61 = vpop.permute.xlu0 %1139 }
0x13d9   : > { %v1149_v48 = vmul.f32 %v1140_v61, %v1101_v3 }
0x13dd   : > { %v1303_v59 = vpop.permute.xlu0 %1302 }
0x13de   : > { %v1312_v63 = vmul.f32 %v2493_v52, %v1303_v59 }
0x1440   : > { %v2083_v47 = vpop.permute.xlu1 %2082 }
0x1441   : > { %2701 = vmatmul.mubr.msk.f32.vlgmr.msra.gmra.mxu1 %vm1375_vm3, %v2083_v47 }
0x144d   : > { %v1189_v62 = vpop.permute.xlu1 %1188 }
0x144e   : > { %v1198_v0 = vmul.f32 %v2477_v31, %v1189_v62 }
0x1450   : > { %v1206_v51 = vadd.f32 %v1198_v0, %v1149_v48 }
0x1452   : > { %v1246_v45 = vpop.permute.xlu1 %1245 }
0x1453   : > { %v1255_v49 = vmul.f32 %v2485_v43, %v1246_v45 }
0x1455   : > { %v1263_v60 = vadd.f32 %v1255_v49, %v1206_v51 }
0x1457   : > { %v1320_v5 = vadd.f32 %v1312_v63, %v1263_v60 }
0x1459   : > { %v1363_v6 = vrot.slane %v1320_v5, 4 }
0x145b   : > { %v1364_v7 = vadd.f32 %v1363_v6, %v1320_v5 }
0x145d   : > { %v1365_v8 = vrot.slane %v1364_v7, 2 }
0x145f   : > { %v1366_v9 = vadd.f32 %v1365_v8, %v1364_v7 }
0x1461   : > { %v1367_v10 = vrot.slane %v1366_v9, 1 }
0x1463   : > { %v1368_v11 = vadd.f32 %v1367_v10, %v1366_v9 }
0x1465   : > { %v2080_v58 = vadd.f32 %v2875_v50, %v1368_v11 }
0x1501   : > { %v2152_v4 = vpop.f32.mrf.mxu1 }
0x1502   : > { %v2156_v12 = vadd.f32 %v2152_v4, %v2080_v58 }
0x1503   : > { %v2702_v57 = vpop.f32.mrf.mxu1 }
0x1504   : > { %2865 = vtanh.f32 %v2156_v12  ;;  %v2508_v24 = vmul.f32 -1.442695, %v2156_v12 }
0x1506   : > { %2867 = vpow2.f32 %v2508_v24 }
0x1511   : > { %v2866_v13 = vpop.eup %2865 }
0x1512   : > { %2166 = vrot.lane.b32.xlu1 %v2866_v13, %s2944_s8 }
0x1513   : > { %v2868_v14 = vpop.eup %2867 }
0x1514   : > { %v2160_v15 = vadd.f32 1.0, %v2868_v14 }
0x1516   : > { %2869 = vrcp.f32 %v2160_v15 }
0x1523   : > { %v2870_v16 = vpop.eup %2869 }
0x1524   : > { %v2164_v22 = vmul.f32 %v2870_v16, %v2073_v32 }
0x1584   : > { %v2167_v20 = vpop.permute.xlu1 %2166 }
0x1585   : > { %v2169_v21 = vmul.f32 %v2870_v16, %v2167_v20 }
0x1587   : > { %2171 = vrot.lane.b32.xlu1 %v2169_v21, %s2945_s9 }
0x15f9   : > { %v2172_v23 = vpop.permute.xlu1 %2171 }
0x15fa   : > { %v2174_v26 = vadd.f32 %v2172_v23, %v2164_v22 }
0x15fc   : > { %2871 = vtanh.f32 %v2174_v26 }
0x1609   : > { %v2872_v29 = vpop.eup %2871 }
0x160a   : > { %2177 = vrot.lane.b32.xlu0 %v2872_v29, %s2944_s8  ;;  %s2461_s8 = sshll.u32 %s3058_s11, 3 }
0x160b   : > { %s422_s15 = scalar_lea.vmem [#allocation4], %s2461_s8 }
0x160c   : > { %s2368_s18 = sshll.u32 %s422_s15, 4  ;;  %s2369_s18 = int_to_ptr.vmem [resolvable:$true] %s2368_s18 }
0x160d   : > { %s2876_s23 = scalar_lea.vmem %s2369_s18, 128  ;;  %p2883_p2 = scmp.lt.s32.totalorder %s2369_s18, %s2881_s16 }
0x160e   : > { %p2877_p13 = scmp.ne.s32.totalorder %s2369_s18, %s2876_s23 }
0x1610   : > { %p2878_p0 = pnand %p2877_p13, %p3030_p6 }
0x1612   : > { %p2879_p1 = pneg %p2878_p0 }
0x167c   : > { %v2178_v54 = vpop.permute.xlu0 %2177 }
0x167d   : > { %v2180_v30 = vmul.f32 %v2870_v16, %v2178_v54 }
0x167f   : > { %2187 = vrot.lane.b32.xlu1 %v2180_v30, %s2945_s9  ;;  %s2511_s9 = sshll.u32 %s2450_s28, 7  ;;  %s2882_s28 = scalar_lea.vmem %s2881_s16, 256 }
0x1680   : > { %s2366_s21 = scalar_lea.hbm %s3559_s7, %s2511_s9  ;;  %p2884_p3 = scmp.lt.s32.totalorder %s2882_s28, %s2876_s23 }
0x1682   : > { %p2885_p4 = por %p2884_p3, %p2883_p2 }
0x1684   : > { %p2886_p5 = pnand %p2885_p4, %p2879_p1 }
0x16f1   : > { %v2188_v55 = vpop.permute.xlu1 %2187 }
0x16f2   : > { %2712 = vmatmul.mubr.msk.f32.vlgmr.msra.gmra.mxu0 %vm1375_vm3, %v2188_v55 }
0x17b2   : > { %v2257_v36 = vpop.f32.mrf.mxu0 }
0x17b3   : > { %v2258_v56 = vadd.f32 %v2257_v36, %v2185_v33 }
0x17b4   : > { %v2713_v17 = vpop.f32.mrf.mxu0 }
0x17b5   : > { %v2264_v35 = vrot.slane %v2258_v56, %v2263_v34 }
0x17b7   : > { %2265 = vxpose.xlu1.b32.start.end [1/1] (short) (narrow) %v2264_v35, 8  ;;  %2298 = vrot.lane.b32.xlu0 %v2264_v35, %s2946_s14 }
0x1829   : > { %v2299_v44 = vpop.permute.xlu0 %2298 }
0x1833   : > { %v2281_v1 = vpop.trf.xlu1 }
0x1834   : > { %v2301_v38 = vadd.f32 %v2299_v44, %v2281_v1 }
0x1836   : > { %2302 = vxpose.xlu0.b32.start.end [1/1] (short) (narrow) %v2301_v38, 8  ;;  %vm2337_vm9 = vcmp.gt.f32.partialorder %v2301_v38, 0.0  ;;  %vm2342_vm12 = vcmp.ge.f32.partialorder %v2301_v38, 0.0 }
0x18b2   : > { %v2318_v39 = vpop.trf.xlu0 }
0x18b3   : > { %vm2335_vm6 = vcmp.ge.f32.partialorder %v2301_v38, %v2318_v39  ;;  %vm2340_vm7 = vcmp.gt.f32.partialorder %v2301_v38, %v2318_v39 }
0x18b4   : > { %vm2336_vm8 = vmand %vm2334_vm4, %vm2335_vm6 }
0x18b5   : > { %vm2338_vm10 = vmand %vm2336_vm8, %vm2337_vm9 }
0x18b6   : > { %vm2341_vm11 = vmand %vm2339_vm5, %vm2340_vm7 }
0x18b7   : > { %vm2343_vm13 = vmand %vm2341_vm11, %vm2342_vm12 }
0x18b8   : > { %vm2344_vm14 = vmor %vm2338_vm10, %vm2343_vm13 }
0x18b9   : > { %v2345_v41 = vsel %vm2344_vm14, %v2301_v38, 0.0 }
0x18ba   : > { %v2346_v37 = vand.u32 2147483647, %v2345_v41 }
0x18bc   : > { %v2347_v32 = vsel %vm445_vm1, %v2346_v37, 0.0 }
0x18bd   : > { %2348 = vadd.xlane.f32.xlu0 %v2347_v32 }
0x1946   : > { %v2349_v28 = vpop.xlane.xlu0 %2348 }
0x1947   : > { %v2350_v18 = vmax.f32 %v2349_v28, 1e-12 }
0x1949   : > { %2873 = vrcp.f32 %v2350_v18 }
0x1956   : > { %v2874_v19 = vpop.eup %2873 }
0x1957   : > { %v2352_v40 = vmul.f32 %v2874_v19, %v2345_v41 }
0x1959   : > { %2353 = vst.msk [vmem:[%s422_s15] sm:$0xff] %vm445_vm1, %v2352_v40 }
0x195a   : > { %2889 = shalt.err (!%p2886_p5)
}
0x195b   : > { %s2890_s17 = scalar_lea.hbm %s2366_s21, 128  ;;  %s2894_s8 = scalar_lea.hbm %s3559_s7, 256 }
0x195c   : > { %p2891_p7 = scmp.ne.s32.totalorder %s2366_s21, %s2890_s17  ;;  %p2895_p12 = scmp.lt.s32.totalorder %s2366_s21, %s3559_s7 }
0x195d   : > { %p2896_p13 = scmp.lt.s32.totalorder %s2894_s8, %s2890_s17 }
0x195e   : > { %p2892_p10 = pnand %p2891_p7, %p3030_p6 }
0x195f   : > { %p2897_p0 = por %p2896_p13, %p2895_p12 }
0x1960   : > { %p2893_p11 = pneg %p2892_p10 }
0x1962   : > { %p2898_p9 = pnand %p2897_p0, %p2893_p11 }
0x1964   : > { %2901 = shalt.err (!%p2898_p9)
}
0x1965   : > { %2714 = dma.vmem_to_hbm [thread:$0]  (%p3030_p6), %s2369_s18, 128, %s2366_s21, %s2355_s22  }
0x1966 PF: > { %s2380_s19 = sand.u32 1, %s2924_s24   ;;  %p3564_p1 = scmp.ge.s32.totalorder %s2936_s27, 2 }
0x1967   : > { %s2381_s20 = scalar_lea.sflag [#allocation5], %s2380_s19 }
0x1968   : > { %p2717_p2 = pnand %p3564_p1, %p3034_p8 }
0x196a   : > { %p2718_p3 = pneg %p2717_p2 }
0x196c   : > { %2919 = dma.done.wait (%p2718_p3), %s2381_s20, 128  }
0x196d   : > { %2921 = vsyncadd (%p2718_p3), %s2381_s20, 4294967168  ;;  %p17_p9 = scmp.ge.s32.totalorder %s3011_s30, 4   ;;  %s3565_s24 = smov %s2928_s25 }
0x196e   : > { %s3566_s25 = smov %s2932_s26  ;;  %s3567_s26 = smov %s3024_s10 }
0x196f   : > { %s3568_s27 = smov %s3011_s30  ;;  %19 = sbr.rel (!%p17_p9) target bundleno = 3 (0x3), region = 175 }
0x1974   :  { %2386 = vsyncpa [#allocation5], 1 }
0x1975   :  { %2388 = vsyncpa [#allocation5 + $0x1], 1 }

</bundles_post_ra>
